<compile_context>
chip_gen: v7x
topology: tpu7x:2x2x1
jax: 0.10.0
libtpu: 0.0.40
codegen_flags: <defaults>
</compile_context>

<pallas_src>
import jax
import jax.numpy as jnp
from jax.experimental import pallas as pl
from jax.experimental.pallas import tpu as pltpu


def _row_tile(total, cap):
    """Largest divisor of `total` that is <= cap and a multiple of 8 (else `total`)."""
    for d in range(min(total, cap), 0, -1):
        if total % d == 0 and (d % 8 == 0 or d == total):
            return d
    return total


# ---------------------------------------------------------------------------
# Kernel 1: fused upsample(x2 nearest) + 3x3 conv (phase form) + BN partial stats.
#   x_ref      : (1, H+2, W+2, Cin)   bf16, halo-padded ORIGINAL-resolution input
#   w_ref      : (9*Cin, 4*Cout)      bf16, phase-decomposed effective weights
#   y_ref      : (1, TH, W, 4*Cout)   f32 conv output in phase layout (dy, dx, cout)
#   sum_ref    : (1, 1, 4*Cout)       f32 partial per-channel(+phase) sum for this tile
#   ssq_ref    : (1, 1, 4*Cout)       f32 partial per-channel(+phase) sum of squares
#   im2col_ref : (TH, W, 9*Cin)       bf16 VMEM scratch (in-VMEM im2col, one GEMM)
# ---------------------------------------------------------------------------
def conv_phase_kernel(x_ref, w_ref, y_ref, sum_ref, ssq_ref, im2col_ref):
    TH = y_ref.shape[1]
    W = y_ref.shape[2]
    Cin = x_ref.shape[3]

    r0 = pl.multiple_of(pl.program_id(1) * TH, TH)   # element row offset of this tile

    # Build the (TH, W, 9*Cin) im2col of the (small) original-resolution padded input.
    for kh in range(3):
        for kw in range(3):
            off = (kh * 3 + kw) * Cin
            im2col_ref[:, :, off:off + Cin] = x_ref[0, pl.ds(r0 + kh, TH),
                                                    pl.ds(kw, W), :]

    # Single MXU matmul: K = 9*Cin, N = 4*Cout (all 4 output phases at once).
    a = im2col_ref[...]                                             # (TH, W, 9*Cin) bf16
    y = jax.lax.dot_general(
        a, w_ref[...],
        dimension_numbers=(((2,), (0,)), ((), ())),
        preferred_element_type=jnp.float32,
    )                                                               # (TH, W, 4*Cout) f32

    y_ref[...] = y[None].astype(y_ref.dtype)

    # BatchNorm partial statistics (f32), folded into this pass -> no extra HBM read.
    s = jnp.sum(jnp.sum(y, axis=0), axis=0)                         # (4*Cout,)
    q = jnp.sum(jnp.sum(y * y, axis=0), axis=0)                     # (4*Cout,)
    sum_ref[...] = s[None, None, :]
    ssq_ref[...] = q[None, None, :]


# ---------------------------------------------------------------------------
# Kernel 2: fused BatchNorm-apply + ReLU on a lane-dense 2D view.
#   y_ref     : (TB, W*4*Cout) f32 conv output rows (phase layout flattened)
#   scale_ref : (1,  W*4*Cout) f32 per-column scale  (gamma / sqrt(var+eps), pre-tiled)
#   shift_ref : (1,  W*4*Cout) f32 per-column shift  (beta - mean*scale, pre-tiled)
#   o_ref     : (TB, W*4*Cout) f32
# ---------------------------------------------------------------------------
def bn_relu_kernel(y_ref, scale_ref, shift_ref, o_ref):
    o_ref[...] = jnp.maximum(
        y_ref[...] * scale_ref[...] + shift_ref[...], 0.0
    ).astype(o_ref.dtype)


def up_conv_forward(x_nchw, w_oihw, bias, gamma, beta, eps=1e-5):
    """Forward pass of up_conv. Input/Output are NCHW float32."""
    N, Cin, H, W = x_nchw.shape
    Cout = w_oihw.shape[0]

    # Conv bias is intentionally unused: with train-mode BN right after the conv, a
    # per-channel constant bias cancels exactly ((y+b) - mean(y+b) == y - mean(y)).
    _ = bias

    # ---- glue (tiny XLA): NHWC + 1-pixel halo pad of the ORIGINAL input, bf16 -------
    x = jnp.transpose(x_nchw, (0, 2, 3, 1))                           # (N, H, W, Cin)
    x_pad = jnp.pad(x, ((0, 0), (1, 1), (1, 1), (0, 0))).astype(jnp.bfloat16)

    # ---- phase-decomposed (sub-pixel) effective weights ------------------------------
    # y[n, 2r+dy, 2c+dx, co] = sum_{kh',kw',ci} x_pad[n, r+kh', c+kw', ci]
    #                                           * W_eff[kh', kw', ci, dy, dx, co]
    w_hwio = jnp.transpose(w_oihw, (2, 3, 1, 0)).astype(jnp.float32)  # (3,3,Cin,Cout)
    # S[phase, k, k'] maps original tap k to padded-window offset k' for that phase.
    S = jnp.array([[[1, 0, 0], [0, 1, 0], [0, 1, 0]],
                   [[0, 1, 0], [0, 1, 0], [0, 0, 1]]], jnp.float32)   # (2, 3, 3)
    w_eff = jnp.einsum('ykp,xlq,klio->pqiyxo', S, S, w_hwio)          # (3,3,Cin,2,2,Cout)
    w_mat = w_eff.reshape(9 * Cin, 4 * Cout).astype(jnp.bfloat16)

    # ---- Pallas conv kernel: grid over (batch, row tiles), both parallel -------------
    TH = _row_tile(H, 64)           # output-row tile (original resolution rows)
    n_tiles = H // TH
    C4 = 4 * Cout

    conv_out, part_sum, part_ssq = pl.pallas_call(
        conv_phase_kernel,
        out_shape=(
            jax.ShapeDtypeStruct((N, H, W, C4), jnp.float32),
            jax.ShapeDtypeStruct((N * n_tiles, 1, C4), jnp.float32),
            jax.ShapeDtypeStruct((N * n_tiles, 1, C4), jnp.float32),
        ),
        grid_spec=pltpu.PrefetchScalarGridSpec(
            num_scalar_prefetch=0,
            grid=(N, n_tiles),
            in_specs=[
                # whole (small, original-resolution) padded image stays resident per n
                pl.BlockSpec((1, H + 2, W + 2, Cin), lambda n, t: (n, 0, 0, 0)),
                pl.BlockSpec((9 * Cin, C4), lambda n, t: (0, 0)),
            ],
            out_specs=[
                pl.BlockSpec((1, TH, W, C4), lambda n, t: (n, t, 0, 0)),
                pl.BlockSpec((1, 1, C4), lambda n, t: (n * n_tiles + t, 0, 0)),
                pl.BlockSpec((1, 1, C4), lambda n, t: (n * n_tiles + t, 0, 0)),
            ],
            scratch_shapes=[pltpu.VMEM((TH, W, 9 * Cin), jnp.bfloat16)],
        ),
        compiler_params=pltpu.CompilerParams(
            dimension_semantics=("parallel", "parallel"),
            vmem_limit_bytes=64 * 1024 * 1024,
        ),
    )(x_pad, w_mat)

    # ---- finish BatchNorm2d batch statistics (tiny XLA reduce over the partials) -----
    cnt = jnp.float32(N * 4 * H * W)                      # elements per output channel
    ch_sum = part_sum.reshape(-1, 4, Cout).sum(axis=(0, 1))
    ch_ssq = part_ssq.reshape(-1, 4, Cout).sum(axis=(0, 1))
    mean = ch_sum / cnt
    var = jnp.maximum(ch_ssq / cnt - mean * mean, 0.0)    # biased variance (train mode)
    scale = gamma * jax.lax.rsqrt(var + eps)
    shift = beta - mean * scale
    # TODO(synk): running_mean / running_var momentum updates (training-state side
    # effect, not part of the functional output) are not reproduced.

    # ---- Pallas fused BN-apply + ReLU on a lane-dense 2D view -------------------------
    WC = W * C4                                 # 512 for the example: multiple of 128
    rows_total = N * H
    TB = _row_tile(rows_total, 256)
    y2d = conv_out.reshape(rows_total, WC)      # same linear layout -> free reshape
    scale_row = jnp.tile(scale, 4 * W).reshape(1, WC)
    shift_row = jnp.tile(shift, 4 * W).reshape(1, WC)

    out2d = pl.pallas_call(
        bn_relu_kernel,
        out_shape=jax.ShapeDtypeStruct((rows_total, WC), jnp.float32),
        grid_spec=pltpu.PrefetchScalarGridSpec(
            num_scalar_prefetch=0,
            grid=(rows_total // TB,),
            in_specs=[
                pl.BlockSpec((TB, WC), lambda i: (i, 0)),
                pl.BlockSpec((1, WC), lambda i: (0, 0)),
                pl.BlockSpec((1, WC), lambda i: (0, 0)),
            ],
            out_specs=pl.BlockSpec((TB, WC), lambda i: (i, 0)),
        ),
        compiler_params=pltpu.CompilerParams(
            dimension_semantics=("parallel",),
            vmem_limit_bytes=64 * 1024 * 1024,
        ),
    )(y2d, scale_row, shift_row)

    # ---- unpack phase layout -> NCHW (2H, 2W); replaces the NHWC->NCHW transpose -----
    out = out2d.reshape(N, H, W, 2, 2, Cout)               # (n, r, c, dy, dx, co)
    out = jnp.transpose(out, (0, 5, 1, 3, 2, 4)).reshape(N, Cout, 2 * H, 2 * W)
    return out


# ---------------------------------------------------------------------------
# Pure-JAX reference (matches the PyTorch module semantics) for verification.
# ---------------------------------------------------------------------------
def _reference(x_nchw, w_oihw, bias, gamma, beta, eps=1e-5):
    x_up = jnp.repeat(jnp.repeat(x_nchw, 2, axis=2), 2, axis=3)
    y = jax.lax.conv_general_dilated(
        x_up, w_oihw, window_strides=(1, 1), padding=((1, 1), (1, 1)),
        dimension_numbers=('NCHW', 'OIHW', 'NCHW'),
        precision=jax.lax.Precision.HIGHEST,
        preferred_element_type=jnp.float32)
    y = y + bias[None, :, None, None]
    mean = jnp.mean(y, axis=(0, 2, 3), keepdims=True)
    var = jnp.mean((y - mean) ** 2, axis=(0, 2, 3), keepdims=True)   # biased (train)
    yn = (y - mean) / jnp.sqrt(var + eps)
    yn = yn * gamma[None, :, None, None] + beta[None, :, None, None]
    return jnp.maximum(yn, 0.0)


if __name__ == "__main__":
    # Small deterministic setup: batch=2, in_ch=4, out_ch=8, spatial=16x16.
    N, in_ch, out_ch, H, W = 2, 4, 8, 16, 16

    key = jax.random.PRNGKey(0)
    kx, kw, kb = jax.random.split(key, 3)

    x = jax.random.normal(kx, (N, in_ch, H, W), dtype=jnp.float32)

    # Conv2d parameters (PyTorch layout: (out_ch, in_ch, 3, 3) + (out_ch,))
    fan_in = in_ch * 3 * 3
    bound = 1.0 / (fan_in ** 0.5)
    w = jax.random.uniform(kw, (out_ch, in_ch, 3, 3), jnp.float32, -bound, bound)
    b = jax.random.uniform(kb, (out_ch,), jnp.float32, -bound, bound)

    # BatchNorm2d default init: gamma=1, beta=0
    gamma = jnp.ones((out_ch,), jnp.float32)
    beta = jnp.zeros((out_ch,), jnp.float32)

    out = up_conv_forward(x, w, b, gamma, beta)
    out = jax.block_until_ready(out)

    assert out.shape == (N, out_ch, 2 * H, 2 * W), out.shape
    assert bool(jnp.all(jnp.isfinite(out)))

    # correctness vs. pure-JAX reference (bf16 MXU operands -> loose tolerance)
    ref = _reference(x, w, b, gamma, beta)
    max_err = float(jnp.max(jnp.abs(out - ref)))
    assert max_err < 1e-1, f"max abs err vs reference: {max_err}"

    print("KERNEL_OK")
</pallas_src>

<mosaic_0001>
module attributes {stable_mosaic.version = 11 : i64} {
  func.func @conv_phase_kernel(%arg0: i32, %arg1: i32, %arg2: memref<1x18x18x4xbf16, #tpu.memory_space<vmem>>, %arg3: memref<36x32xbf16, #tpu.memory_space<vmem>>, %arg4: memref<1x16x16x32xf32, #tpu.memory_space<vmem>>, %arg5: memref<1x1x32xf32, #tpu.memory_space<vmem>>, %arg6: memref<1x1x32xf32, #tpu.memory_space<vmem>>, %arg7: memref<16x16x36xbf16, #tpu.memory_space<vmem>>) attributes {dimension_semantics = [#tpu.dimension_semantics<parallel>, #tpu.dimension_semantics<parallel>], iteration_bounds = array<i64: 2, 1>, scalar_prefetch = 0 : i64, scratch_operands = 1 : i64, tpu.core_type = #tpu.core_type<tc>, window_params = [{transform_indices = @transform_0, window_bounds = array<i64: 1, 18, 18, 4>}, {pipeline_mode = #tpu.pipeline_mode<synchronous>, transform_indices = @transform_1, window_bounds = array<i64: 36, 32>}, {transform_indices = @transform_2, window_bounds = array<i64: 1, 16, 16, 32>}, {transform_indices = @transform_3, window_bounds = array<i64: 1, 1, 32>}, {transform_indices = @transform_4, window_bounds = array<i64: 1, 1, 32>}]} {
    %c16_i32 = arith.constant 16 : i32
    %0 = arith.muli %arg1, %c16_i32 : i32
    %1 = tpu.assume_multiple %0, 16 : i32
    %c0_i32 = arith.constant 0 : i32
    %2 = arith.addi %1, %c0_i32 : i32
    %c0 = arith.constant 0 : index
    %3 = arith.index_cast %2 : i32 to index
    %c0_0 = arith.constant 0 : index
    %c0_1 = arith.constant 0 : index
    %4 = vector.load %arg2[%c0, %3, %c0_0, %c0_1] : memref<1x18x18x4xbf16, #tpu.memory_space<vmem>>, vector<1x16x16x4xbf16>
    %5 = vector.shape_cast %4 : vector<1x16x16x4xbf16> to vector<16x16x4xbf16>
    %c0_2 = arith.constant 0 : index
    %c0_3 = arith.constant 0 : index
    %c0_4 = arith.constant 0 : index
    %6 = vector.load %arg7[%c0_2, %c0_3, %c0_4] : memref<16x16x36xbf16, #tpu.memory_space<vmem>>, vector<16x16x4xbf16>
    tpu.vector_store %arg7[%c0_2, %c0_3, %c0_4], %5 {strides = array<i32>} : memref<16x16x36xbf16, #tpu.memory_space<vmem>>, vector<16x16x4xbf16>,
    %c0_i32_5 = arith.constant 0 : i32
    %7 = arith.addi %1, %c0_i32_5 : i32
    %c0_6 = arith.constant 0 : index
    %8 = arith.index_cast %7 : i32 to index
    %c1 = arith.constant 1 : index
    %c0_7 = arith.constant 0 : index
    %9 = vector.load %arg2[%c0_6, %8, %c1, %c0_7] : memref<1x18x18x4xbf16, #tpu.memory_space<vmem>>, vector<1x16x16x4xbf16>
    %10 = vector.shape_cast %9 : vector<1x16x16x4xbf16> to vector<16x16x4xbf16>
    %c0_8 = arith.constant 0 : index
    %c0_9 = arith.constant 0 : index
    %c4 = arith.constant 4 : index
    %11 = vector.load %arg7[%c0_8, %c0_9, %c4] : memref<16x16x36xbf16, #tpu.memory_space<vmem>>, vector<16x16x4xbf16>
    tpu.vector_store %arg7[%c0_8, %c0_9, %c4], %10 {strides = array<i32>} : memref<16x16x36xbf16, #tpu.memory_space<vmem>>, vector<16x16x4xbf16>,
    %c0_i32_10 = arith.constant 0 : i32
    %12 = arith.addi %1, %c0_i32_10 : i32
    %c0_11 = arith.constant 0 : index
    %13 = arith.index_cast %12 : i32 to index
    %c2 = arith.constant 2 : index
    %c0_12 = arith.constant 0 : index
    %14 = vector.load %arg2[%c0_11, %13, %c2, %c0_12] : memref<1x18x18x4xbf16, #tpu.memory_space<vmem>>, vector<1x16x16x4xbf16>
    %15 = vector.shape_cast %14 : vector<1x16x16x4xbf16> to vector<16x16x4xbf16>
    %c0_13 = arith.constant 0 : index
    %c0_14 = arith.constant 0 : index
    %c8 = arith.constant 8 : index
    %16 = vector.load %arg7[%c0_13, %c0_14, %c8] : memref<16x16x36xbf16, #tpu.memory_space<vmem>>, vector<16x16x4xbf16>
    tpu.vector_store %arg7[%c0_13, %c0_14, %c8], %15 {strides = array<i32>} : memref<16x16x36xbf16, #tpu.memory_space<vmem>>, vector<16x16x4xbf16>,
    %c1_i32 = arith.constant 1 : i32
    %17 = arith.addi %1, %c1_i32 : i32
    %c0_15 = arith.constant 0 : index
    %18 = arith.index_cast %17 : i32 to index
    %c0_16 = arith.constant 0 : index
    %c0_17 = arith.constant 0 : index
    %19 = vector.load %arg2[%c0_15, %18, %c0_16, %c0_17] : memref<1x18x18x4xbf16, #tpu.memory_space<vmem>>, vector<1x16x16x4xbf16>
    %20 = vector.shape_cast %19 : vector<1x16x16x4xbf16> to vector<16x16x4xbf16>
    %c0_18 = arith.constant 0 : index
    %c0_19 = arith.constant 0 : index
    %c12 = arith.constant 12 : index
    %21 = vector.load %arg7[%c0_18, %c0_19, %c12] : memref<16x16x36xbf16, #tpu.memory_space<vmem>>, vector<16x16x4xbf16>
    tpu.vector_store %arg7[%c0_18, %c0_19, %c12], %20 {strides = array<i32>} : memref<16x16x36xbf16, #tpu.memory_space<vmem>>, vector<16x16x4xbf16>,
    %c1_i32_20 = arith.constant 1 : i32
    %22 = arith.addi %1, %c1_i32_20 : i32
    %c0_21 = arith.constant 0 : index
    %23 = arith.index_cast %22 : i32 to index
    %c1_22 = arith.constant 1 : index
    %c0_23 = arith.constant 0 : index
    %24 = vector.load %arg2[%c0_21, %23, %c1_22, %c0_23] : memref<1x18x18x4xbf16, #tpu.memory_space<vmem>>, vector<1x16x16x4xbf16>
    %25 = vector.shape_cast %24 : vector<1x16x16x4xbf16> to vector<16x16x4xbf16>
    %c0_24 = arith.constant 0 : index
    %c0_25 = arith.constant 0 : index
    %c16 = arith.constant 16 : index
    %26 = vector.load %arg7[%c0_24, %c0_25, %c16] : memref<16x16x36xbf16, #tpu.memory_space<vmem>>, vector<16x16x4xbf16>
    tpu.vector_store %arg7[%c0_24, %c0_25, %c16], %25 {strides = array<i32>} : memref<16x16x36xbf16, #tpu.memory_space<vmem>>, vector<16x16x4xbf16>,
    %c1_i32_26 = arith.constant 1 : i32
    %27 = arith.addi %1, %c1_i32_26 : i32
    %c0_27 = arith.constant 0 : index
    %28 = arith.index_cast %27 : i32 to index
    %c2_28 = arith.constant 2 : index
    %c0_29 = arith.constant 0 : index
    %29 = vector.load %arg2[%c0_27, %28, %c2_28, %c0_29] : memref<1x18x18x4xbf16, #tpu.memory_space<vmem>>, vector<1x16x16x4xbf16>
    %30 = vector.shape_cast %29 : vector<1x16x16x4xbf16> to vector<16x16x4xbf16>
    %c0_30 = arith.constant 0 : index
    %c0_31 = arith.constant 0 : index
    %c20 = arith.constant 20 : index
    %31 = vector.load %arg7[%c0_30, %c0_31, %c20] : memref<16x16x36xbf16, #tpu.memory_space<vmem>>, vector<16x16x4xbf16>
    tpu.vector_store %arg7[%c0_30, %c0_31, %c20], %30 {strides = array<i32>} : memref<16x16x36xbf16, #tpu.memory_space<vmem>>, vector<16x16x4xbf16>,
    %c2_i32 = arith.constant 2 : i32
    %32 = arith.addi %1, %c2_i32 : i32
    %c0_32 = arith.constant 0 : index
    %33 = arith.index_cast %32 : i32 to index
    %c0_33 = arith.constant 0 : index
    %c0_34 = arith.constant 0 : index
    %34 = vector.load %arg2[%c0_32, %33, %c0_33, %c0_34] : memref<1x18x18x4xbf16, #tpu.memory_space<vmem>>, vector<1x16x16x4xbf16>
    %35 = vector.shape_cast %34 : vector<1x16x16x4xbf16> to vector<16x16x4xbf16>
    %c0_35 = arith.constant 0 : index
    %c0_36 = arith.constant 0 : index
    %c24 = arith.constant 24 : index
    %36 = vector.load %arg7[%c0_35, %c0_36, %c24] : memref<16x16x36xbf16, #tpu.memory_space<vmem>>, vector<16x16x4xbf16>
    tpu.vector_store %arg7[%c0_35, %c0_36, %c24], %35 {strides = array<i32>} : memref<16x16x36xbf16, #tpu.memory_space<vmem>>, vector<16x16x4xbf16>,
    %c2_i32_37 = arith.constant 2 : i32
    %37 = arith.addi %1, %c2_i32_37 : i32
    %c0_38 = arith.constant 0 : index
    %38 = arith.index_cast %37 : i32 to index
    %c1_39 = arith.constant 1 : index
    %c0_40 = arith.constant 0 : index
    %39 = vector.load %arg2[%c0_38, %38, %c1_39, %c0_40] : memref<1x18x18x4xbf16, #tpu.memory_space<vmem>>, vector<1x16x16x4xbf16>
    %40 = vector.shape_cast %39 : vector<1x16x16x4xbf16> to vector<16x16x4xbf16>
    %c0_41 = arith.constant 0 : index
    %c0_42 = arith.constant 0 : index
    %c28 = arith.constant 28 : index
    %41 = vector.load %arg7[%c0_41, %c0_42, %c28] : memref<16x16x36xbf16, #tpu.memory_space<vmem>>, vector<16x16x4xbf16>
    tpu.vector_store %arg7[%c0_41, %c0_42, %c28], %40 {strides = array<i32>} : memref<16x16x36xbf16, #tpu.memory_space<vmem>>, vector<16x16x4xbf16>,
    %c2_i32_43 = arith.constant 2 : i32
    %42 = arith.addi %1, %c2_i32_43 : i32
    %c0_44 = arith.constant 0 : index
    %43 = arith.index_cast %42 : i32 to index
    %c2_45 = arith.constant 2 : index
    %c0_46 = arith.constant 0 : index
    %44 = vector.load %arg2[%c0_44, %43, %c2_45, %c0_46] : memref<1x18x18x4xbf16, #tpu.memory_space<vmem>>, vector<1x16x16x4xbf16>
    %45 = vector.shape_cast %44 : vector<1x16x16x4xbf16> to vector<16x16x4xbf16>
    %c0_47 = arith.constant 0 : index
    %c0_48 = arith.constant 0 : index
    %c32 = arith.constant 32 : index
    %46 = vector.load %arg7[%c0_47, %c0_48, %c32] : memref<16x16x36xbf16, #tpu.memory_space<vmem>>, vector<16x16x4xbf16>
    tpu.vector_store %arg7[%c0_47, %c0_48, %c32], %45 {strides = array<i32>} : memref<16x16x36xbf16, #tpu.memory_space<vmem>>, vector<16x16x4xbf16>,
    %c0_49 = arith.constant 0 : index
    %c0_50 = arith.constant 0 : index
    %c0_51 = arith.constant 0 : index
    %47 = vector.load %arg7[%c0_49, %c0_50, %c0_51] : memref<16x16x36xbf16, #tpu.memory_space<vmem>>, vector<16x16x36xbf16>
    %c0_52 = arith.constant 0 : index
    %c0_53 = arith.constant 0 : index
    %48 = vector.load %arg3[%c0_52, %c0_53] : memref<36x32xbf16, #tpu.memory_space<vmem>>, vector<36x32xbf16>
    %cst = arith.constant dense<0.000000e+00> : vector<16x16x32xf32>
    %49 = tpu.matmul %47, %48, %cst {dimension_numbers = #tpu.dot_dimension_numbers<[2], [0], [0, 1], [1], [0, 0, 0, 1, 1, 1], [], []>} : vector<16x16x36xbf16>, vector<36x32xbf16>, vector<16x16x32xf32> -> vector<16x16x32xf32>
    %50 = vector.shape_cast %49 : vector<16x16x32xf32> to vector<1x16x16x32xf32>
    %c0_54 = arith.constant 0 : index
    %c0_55 = arith.constant 0 : index
    %c0_56 = arith.constant 0 : index
    %c0_57 = arith.constant 0 : index
    %51 = vector.load %arg4[%c0_54, %c0_55, %c0_56, %c0_57] : memref<1x16x16x32xf32, #tpu.memory_space<vmem>>, vector<1x16x16x32xf32>
    tpu.vector_store %arg4[%c0_54, %c0_55, %c0_56, %c0_57], %50 {strides = array<i32>} : memref<1x16x16x32xf32, #tpu.memory_space<vmem>>, vector<1x16x16x32xf32>,
    %cst_58 = arith.constant dense<0.000000e+00> : vector<16x32xf32>
    %52 = vector.multi_reduction <add>, %49, %cst_58 [0] : vector<16x16x32xf32> to vector<16x32xf32>
    %cst_59 = arith.constant dense<0.000000e+00> : vector<32xf32>
    %53 = vector.multi_reduction <add>, %52, %cst_59 [0] : vector<16x32xf32> to vector<32xf32>
    %54 = arith.mulf %49, %49 : vector<16x16x32xf32>
    %cst_60 = arith.constant dense<0.000000e+00> : vector<16x32xf32>
    %55 = vector.multi_reduction <add>, %54, %cst_60 [0] : vector<16x16x32xf32> to vector<16x32xf32>
    %cst_61 = arith.constant dense<0.000000e+00> : vector<32xf32>
    %56 = vector.multi_reduction <add>, %55, %cst_61 [0] : vector<16x32xf32> to vector<32xf32>
    %57 = vector.shape_cast %53 : vector<32xf32> to vector<1x1x32xf32>
    %c0_62 = arith.constant 0 : index
    %c0_63 = arith.constant 0 : index
    %c0_64 = arith.constant 0 : index
    %58 = vector.load %arg5[%c0_62, %c0_63, %c0_64] : memref<1x1x32xf32, #tpu.memory_space<vmem>>, vector<1x1x32xf32>
    tpu.vector_store %arg5[%c0_62, %c0_63, %c0_64], %57 {strides = array<i32>} : memref<1x1x32xf32, #tpu.memory_space<vmem>>, vector<1x1x32xf32>,
    %59 = vector.shape_cast %56 : vector<32xf32> to vector<1x1x32xf32>
    %c0_65 = arith.constant 0 : index
    %c0_66 = arith.constant 0 : index
    %c0_67 = arith.constant 0 : index
    %60 = vector.load %arg6[%c0_65, %c0_66, %c0_67] : memref<1x1x32xf32, #tpu.memory_space<vmem>>, vector<1x1x32xf32>
    tpu.vector_store %arg6[%c0_65, %c0_66, %c0_67], %59 {strides = array<i32>} : memref<1x1x32xf32, #tpu.memory_space<vmem>>, vector<1x1x32xf32>,
    return
  }
  func.func @transform_0(%arg0: i32, %arg1: i32) -> (i32, i32, i32, i32) {
    %c0_i32 = arith.constant 0 : i32
    %c0_i32_0 = arith.constant 0 : i32
    %c0_i32_1 = arith.constant 0 : i32
    %c0_i32_2 = arith.constant 0 : i32
    return %arg0, %c0_i32, %c0_i32_0, %c0_i32_1 : i32, i32, i32, i32
  }
  func.func @transform_1(%arg0: i32, %arg1: i32) -> (i32, i32) {
    %c0_i32 = arith.constant 0 : i32
    %c0_i32_0 = arith.constant 0 : i32
    %c0_i32_1 = arith.constant 0 : i32
    return %c0_i32, %c0_i32_0 : i32, i32
  }
  func.func @transform_2(%arg0: i32, %arg1: i32) -> (i32, i32, i32, i32) {
    %c0_i32 = arith.constant 0 : i32
    %c0_i32_0 = arith.constant 0 : i32
    %c0_i32_1 = arith.constant 0 : i32
    return %arg0, %arg1, %c0_i32, %c0_i32_0 : i32, i32, i32, i32
  }
  func.func @transform_3(%arg0: i32, %arg1: i32) -> (i32, i32, i32) {
    %c1_i32 = arith.constant 1 : i32
    %0 = arith.muli %arg0, %c1_i32 : i32
    %1 = arith.addi %0, %arg1 : i32
    %c0_i32 = arith.constant 0 : i32
    %c0_i32_0 = arith.constant 0 : i32
    %c0_i32_1 = arith.constant 0 : i32
    return %1, %c0_i32, %c0_i32_0 : i32, i32, i32
  }
  func.func @transform_4(%arg0: i32, %arg1: i32) -> (i32, i32, i32) {
    %c1_i32 = arith.constant 1 : i32
    %0 = arith.muli %arg0, %c1_i32 : i32
    %1 = arith.addi %0, %arg1 : i32
    %c0_i32 = arith.constant 0 : i32
    %c0_i32_0 = arith.constant 0 : i32
    %c0_i32_1 = arith.constant 0 : i32
    return %1, %c0_i32, %c0_i32_0 : i32, i32, i32
  }
}

</mosaic_0001>

<bundles_post_ra>
// kernel: tpu_custom_call.1
= control target key start
LH: loop header
LB: loop body
LE: loop exit
PB: predicated region body
PF: predicated region fallthrough
CT: control target
= control target key end

     0   :  { %10 = vsyncpa [#allocation4], 0  ;;  %s5868_s0 = inlined_call_operand.hbm [shape: bf16[2,18,18,4], index: 0, kind: input, shape index: {}]   ;;  %s5869_s1 = inlined_call_operand.hbm [shape: bf16[36,32], index: 1, kind: input, shape index: {}]   ;;  %s5870_s2 = inlined_call_operand.hbm [shape: f32[2,16,16,32], index: 2, kind: output, shape index: {0}]   ;;  %s5871_s3 = inlined_call_operand.hbm [shape: f32[2,1,32], index: 3, kind: output, shape index: {1}]   ;;  %s5872_s4 = inlined_call_operand.hbm [shape: f32[2,1,32], index: 4, kind: output, shape index: {2}]  }
   0x1   :  { %12 = vsyncpa [#allocation4 + $0x1], 0 }
   0x2   :  { %13 = vsyncpa [#allocation7], 0 }
   0x3   :  { %14 = vsyncpa [#allocation5], 0 }
   0x4   :  { %16 = vsyncpa [#allocation5 + $0x1], 0 }
   0x5   :  { %17 = vsyncpa [#allocation10], 0 }
   0x6   :  { %19 = vsyncpa [#allocation10 + $0x1], 0  ;;  %s4804_s15 = smov 0   ;;  %s4806_s16 = smov 0  }
   0x7   :  { %s4808_s17 = smov 0   ;;  %s4810_s18 = smov 0  }
   0x8   :  { %s4812_s19 = smov 0   ;;  %s4814_s20 = smov 0  }
   0x9 LB: > { %s4835_s21 = sadd.s32 4294967295, %s4761_s20   ;;  %s5876_s22 = sadd.s32 4294967294, %s4761_s20   ;;  %s4761_s20 = sphi %s4814_s20, %s25_s20   ;;  %s4757_s19 = sphi %s4812_s19, %s5895_s19   ;;  %s4753_s18 = sphi %s4810_s18, %s5894_s18   ;;  %s4749_s17 = sphi %s4808_s17, %s5893_s17   ;;  %s4745_s16 = sphi %s4806_s16, %s5892_s16   ;;  %s4741_s15 = sphi %s4804_s15, %s5891_s15  }
   0xa   : > { %p57_p0 = scmp.ne.s32.totalorder %s4745_s16, %s4741_s15  ;;  %p5873_p1 = scmp.eq.s32.totalorder %s4835_s21, 0 }
   0xb   : > { %p110_p3 = scmp.eq.s32.totalorder %s5876_s22, 1  ;;  %p3622_p5 = scmp.ge.s32.totalorder %s4761_s20, 1 }
   0xc   : > { %p4846_p4 = por %p5873_p1, %p57_p0  ;;  %p173_p7 = scmp.lt.s32.totalorder %s4761_s20, 3 }
   0xd   : > { %p4851_p6 = por %p110_p3, %p57_p0  ;;  %s4763_s26 = smov [#allocation6]  }
   0xe   : > { %s5877_s23 = scalar_select %p4846_p4, 1, 0 }
   0xf   : > { %s5878_s24 = scalar_select %p4851_p6, 1, 0 }
  0x10   : > { %p4856_p8 = pnand %p3622_p5, %p173_p7  ;;  %s185_s27 = sshll.u32 %s4763_s26, 4  ;;  %s186_s27 = int_to_ptr.vmem [resolvable:$true] %s185_s27 }
  0x11   : > { %s37_s29 = sadd.s32 1, %s4757_s19  ;;  %s4557_s6 = scalar_lea.hbm %s5869_s1, 320 }
  0x12   : > { %s5879_s25 = scalar_select %p4856_p8, 1, 0 }
  0x13   : > { %p4232_p9 = pneg %p4856_p8  ;;  %p4558_p12 = scmp.ne.s32.totalorder %s5869_s1, %s4557_s6 }
  0x14   : > { %p4564_p5 = scmp.lt.u32.totalorder %s4557_s6, %s5869_s1 }
  0x15   : > { %p4865_p11 = pnand %p4232_p9, %p5873_p1 }
  0x17   : > { %p4559_p13 = pneg %p4865_p11 }
  0x19   : > { %p4560_p0 = pnand %p4559_p13, %p4558_p12 }
  0x1b   : > { %p4561_p3 = pneg %p4560_p0 }
  0x1d   : > { %p4566_p7 = pnand %p4564_p5, %p4561_p3 }
  0x1f   : > { %4569 = shalt.err (!%p4566_p7)
}
  0x20   : > { %s4570_s11 = scalar_lea.vmem %s186_s27, 320  ;;  %p4578_p2 = scmp.lt.s32.totalorder %s186_s27, %s186_s27 }
  0x21   : > { %p4571_p9 = scmp.ne.s32.totalorder %s186_s27, %s4570_s11  ;;  %p4579_p6 = scmp.lt.s32.totalorder %s4570_s11, %s4570_s11 }
  0x23   : > { %p4573_p10 = pnand %p4571_p9, %p4559_p13  ;;  %p4580_p4 = por %p4579_p6, %p4578_p2 }
  0x25   : > { %p4574_p1 = pneg %p4573_p10 }
  0x27   : > { %p4581_p8 = pnand %p4580_p4, %p4574_p1 }
  0x29   : > { %4584 = shalt.err (!%p4581_p8)
}
  0x2a   : > { %s4764_s12 = smov 64   ;;  %s4765_s13 = smov 4  }
  0x2b   : > { %4235 = dma.hbm_to_vmem [thread:$0]  (!%p4865_p11), %s5869_s1, 320, %s186_s27, [#allocation7], %s4764_s12, %s4764_s12, %s4765_s13  }
  0x2c   : > { %p39_p1 = scmp.ge.s32.totalorder %s37_s29, 2  ;;  %s44_s30 = sadd.s32 1, %s4749_s17 }
  0x2d   : > { %p51_p2 = scmp.ne.s32.totalorder %s4749_s17, %s4745_s16  ;;  %p52_p4 = scmp.eq.s32.totalorder %s4761_s20, 0 }
  0x2e   : > { %s5897_s29 = smov (%p39_p1, %s37_s29), 0  ;;  %p5881_p8 = scmp.eq.s32.totalorder %s4835_s21, 1 }
  0x2f   : > { %p53_p6 = por %p52_p4, %p51_p2  ;;  %s41_s28 = ssub.s32 %s4757_s19, %s5897_s29 }
  0x30   : > { %p4897_p10 = por %p5881_p8, %p51_p2  ;;  %p4251_p12 = scmp.lt.s32.totalorder %s4761_s20, 2 }
  0x31   : > { %p42_p13 = scmp.eq.s32.totalorder %s41_s28, 0  ;;  %s199_s6 = sand.u32 1, %s4749_s17  }
  0x32   : > { %s4217_s7 = smul.u32 216, %s199_s6  ;;  %p4909_p11 = pnand %p4251_p12, %p53_p6 }
  0x33   : > { %s4906_s8 = scalar_select %p42_p13, %s4749_s17, %s44_s30  }
  0x34   : > { %s4218_s27 = smul.u32 3456, %s4757_s19  ;;  %s203_s9 = scalar_lea.vmem [#allocation3], %s4217_s7 }
  0x35   : > { %s210_s10 = sshll.u32 %s203_s9, 4  ;;  %s4920_s30 = scalar_lea.sflag [#allocation4], %s199_s6  ;;  %s4918_s10 = int_to_ptr.vmem [resolvable:$true] %s210_s10 }
  0x36   : > { %s4916_s22 = scalar_lea.hbm %s5868_s0, %s4218_s27  ;;  %p4587_p3 = pneg %p4909_p11 }
  0x37   : > { %s4585_s28 = scalar_lea.hbm %s4916_s22, 3456  ;;  %s4590_s27 = scalar_lea.hbm %s5868_s0, 6912 }
  0x38   : > { %p4586_p0 = scmp.ne.s32.totalorder %s4916_s22, %s4585_s28  ;;  %p4591_p9 = scmp.lt.u32.totalorder %s4916_s22, %s5868_s0 }
  0x39   : > { %p4592_p1 = scmp.lt.u32.totalorder %s4590_s27, %s4585_s28  ;;  %p4594_p4 = scmp.lt.u32.totalorder %s4585_s28, %s4916_s22 }
  0x3a   : > { %p4588_p5 = pnand %p4587_p3, %p4586_p0 }
  0x3b   : > { %p4593_p2 = por %p4592_p1, %p4591_p9 }
  0x3c   : > { %p4589_p7 = pneg %p4588_p5 }
  0x3d   : > { %p4595_p6 = por %p4594_p4, %p4593_p2 }
  0x3f   : > { %p4596_p8 = pnand %p4595_p6, %p4589_p7 }
  0x41   : > { %4599 = shalt.err (!%p4596_p8)
}
  0x42   : > { %s4600_s6 = scalar_lea.vmem %s4918_s10, 3456  ;;  %s4766_s7 = smov [#allocation3]  }
  0x43   : > { %p4601_p12 = scmp.ne.s32.totalorder %s4918_s10, %s4600_s6  ;;  %s4605_s9 = sshll.u32 %s4766_s7, 4  ;;  %s4606_s9 = int_to_ptr.vmem [resolvable:$false] %s4605_s9 }
  0x44   : > { %s4607_s14 = scalar_lea.vmem %s4606_s9, 6912  ;;  %p4608_p5 = scmp.lt.s32.totalorder %s4918_s10, %s4606_s9 }
  0x45   : > { %p4603_p13 = pnand %p4601_p12, %p4587_p3  ;;  %p4609_p9 = scmp.lt.s32.totalorder %s4607_s14, %s4600_s6 }
  0x47   : > { %p4604_p0 = pneg %p4603_p13  ;;  %p4610_p1 = por %p4609_p9, %p4608_p5 }
  0x49   : > { %p4611_p2 = pnand %p4610_p1, %p4604_p0 }
  0x4b   : > { %4614 = shalt.err (!%p4611_p2)
}
  0x4c   : > { %4239 = dma.hbm_to_vmem [thread:$0]  (!%p4909_p11), %s4916_s22, 3456, %s4918_s10, %s4920_s30, %s4764_s12, %s4764_s12, %s4765_s13  }
  0x4d   : > { %p5884_p3 = scmp.ne.s32.totalorder %s5879_s25, 0 }
  0x4e   : > { %s4954_s28 = sand.u32 (!%p5884_p3), 1, %s4745_s16   ;;  %p5885_p7 = scmp.ne.s32.totalorder (!%p5884_p3), %s5877_s23, 0 }
  0x4f   : > { %222 = sbr.rel (%p5884_p3) target bundleno = 757 (0x2f5), region = 28  ;;  %s225_s26 = scalar_lea.sflag (!%p5884_p3), [#allocation4], %s4954_s28 }
  0x50   : > { %s4219_s27 = smul.u32 (!%p5884_p3), 216, %s4954_s28 }
  0x52   : > { %s4958_s6 = scalar_lea.vmem (!%p5884_p3), [#allocation3], %s4219_s27 }
  0x56   : > { %4724 = dma.done.wait (%p5885_p7), %s225_s26, 3456  }
  0x57   : > { %4726 = vsyncadd (%p5885_p7), %s225_s26, 4294963840  ;;  %p5886_p11 = scmp.eq.s32.totalorder %s4835_s21, 0 }
  0x59   : > { %4728 = dma.done.wait (%p5886_p11), [#allocation7], 320   ;;  %p5887_p4 = pmov %p5886_p11 }
  0x5a   : > { %vm1028_vm0 = vcmask 1046528   ;;  %v4314_v0 = vld [vmem:[%s4958_s6 + $0x18] sm:$0xff]   ;;  %v4315_v1 = vld [vmem:[%s4958_s6 + $0xc] sm:$0xff]   ;;  %s4767_s22 = smov 12   ;;  %v4322_v4 = vld [vmem:[%s4958_s6] sm:$0xff]   ;;  %s4768_s23 = smov 20  }
  0x5b   : > { %4730 = vsyncadd (%p5887_p4), [#allocation7], 4294966976  ;;  %1260 = vrot.lane.b32.xlu1 %v4314_v0, %s4767_s22  ;;  %1258 = vrot.lane.b32.xlu0 %v4315_v1, %s4767_s22  ;;  %v4316_v2 = vld [vmem:[%s4958_s6 + $0xc] sm:$0xfe]   ;;  %v4318_v7 = vld [vmem:[%s4958_s6] sm:$0xfe]  }
  0x5c   : > { %v4317_v3 = vld [vmem:[%s4958_s6 + $0x14] ss:$0 sps:$4 sm:$0x11]   ;;  %v1932_v5 = vrot.slane %v4316_v2, 1  ;;  %vm594_vm1 = vsmask.f32 7424 }
  0x5d   : > { %v1933_v6 = vrot.slane %v4317_v3, 1  ;;  %v4319_v8 = vld [vmem:[%s4958_s6 + $0x8] ss:$0 sps:$4 sm:$0x11]   ;;  %v596_v9 = vshrl.u32 %v4322_v4, 16  ;;  %v1029_v11 = vrot.slane %v4318_v7, 1 }
  0x5e   : > { %v4320_v12 = vld [vmem:[%s4958_s6 + $0xc] sm:$0xfe]   ;;  %v598_v13 = vshll.u32 %v4322_v4, 16  ;;  %v1030_v14 = vrot.slane %v4319_v8, 1  ;;  %s4769_s25 = smov 8   ;;  %v4328_v31 = vld [vmem:[%s4958_s6 + $0x18] sm:$0xff]  }
  0x5f   : > { %v1934_v10 = vsel %vm1028_vm0, %v1932_v5, %v1933_v6  ;;  %v4321_v15 = vld [vmem:[%s4958_s6 + $0x14] ss:$0 sps:$4 sm:$0x11]   ;;  %v1032_v16 = vrot.slane %v4320_v12, 1  ;;  %v4324_v21 = vld [vmem:[%s4958_s6 + $0x18] sm:$0xfe]  }
  0x60   : > { %1980 = vrot.lane.b32.xlu0 %v1934_v10, %s4768_s23  ;;  %v600_v17 = vrot.slane %v598_v13, 1  ;;  %v1031_v18 = vsel %vm1028_vm0, %v1029_v11, %v1030_v14  ;;  %v1033_v19 = vrot.slane %v4321_v15, 1  ;;  %v4323_v20 = vld [vmem:[%s4958_s6 + $0x8] ss:$0 sps:$4 sm:$0x11]   ;;  %v1935_v26 = vrot.slane %v4324_v21, 1 }
  0x61   : > { %1077 = vrot.lane.b32.xlu1 %v1031_v18, %s4769_s25  ;;  %v603_v24 = vshll.u32 %v4323_v20, 16  ;;  %v4325_v25 = vld [vmem:[%s4958_s6 + $0x20] ss:$0 sps:$4 sm:$0x11]   ;;  %v4326_v27 = vld [vmem:[%s4958_s6 + $0xc] sm:$0xff]   ;;  %s4770_s12 = smov 4  }
  0x62   : > { %v1034_v22 = vsel %vm1028_vm0, %v1032_v16, %v1033_v19  ;;  %v601_v23 = vor.u32 %v600_v17, %v596_v9  ;;  %v1936_v29 = vrot.slane %v4325_v25, 1  ;;  %v4327_v30 = vld [vmem:[%s4958_s6 + $0x14] ss:$0 sps:$4 sm:$0x11]   ;;  %v608_v32 = vshrl.u32 %v4326_v27, 16  ;;  %v4330_v41 = vld [vmem:[%s4958_s6 + $0xc] sm:$0xff]  }
  0x63   : > { %v605_v28 = vrot.slane %v603_v24, 1  ;;  %v610_v33 = vshll.u32 %v4326_v27, 16  ;;  %v615_v36 = vshll.u32 %v4327_v30, 16  ;;  %v4329_v37 = vld [vmem:[%s4958_s6 + $0x20] ss:$0 sps:$4 sm:$0x11]  }
  0x64   : > { %v1937_v35 = vsel %vm1028_vm0, %v1935_v26, %v1936_v29  ;;  %v1512_v39 = vshrl.u32 %v4328_v31, 16  ;;  %v1514_v40 = vshll.u32 %v4328_v31, 16  ;;  %v1519_v43 = vshll.u32 %v4329_v37, 16  ;;  %v4331_v46 = vld [vmem:[%s4958_s6 + $0x14] ss:$0 sps:$4 sm:$0x11]  }
  0x65   : > { %1079 = vrot.lane.b32.xlu1 %v1034_v22, %s4769_s25  ;;  %v606_v34 = vsel %vm594_vm1, %v601_v23, %v605_v28  ;;  %v612_v38 = vrot.slane %v610_v33, 1  ;;  %v617_v42 = vrot.slane %v615_v36, 1  ;;  %v1500_v47 = vshrl.u32 %v4330_v41, 16  ;;  %v4332_v54 = vld [vmem:[%s4958_s6 + $0x24] sm:$0xff]   ;;  %s4771_s13 = smov 16   ;;  %v4333_v59 = vld [vmem:[%s4958_s6 + $0x18] sm:$0xff]  }
  0x66   : > { %787 = vrot.lane.b32.xlu0 %v606_v34, %s4770_s12  ;;  %v1516_v45 = vrot.slane %v1514_v40, 1  ;;  %v1502_v48 = vshll.u32 %v4330_v41, 16  ;;  %v1521_v49 = vrot.slane %v1519_v43, 1  ;;  %v1507_v53 = vshll.u32 %v4331_v46, 16  ;;  %v4334_v58 = vld [vmem:[%s4958_s6 + $0x24] sm:$0xff]   ;;  %v4336_v61 = vld [vmem:[%s4958_s6 + $0x18] sm:$0xff]  }
  0x67   : > { %v613_v44 = vor.u32 %v612_v38, %v608_v32  ;;  %v4335_v60 = vld [vmem:[%s4958_s6 + $0x2c] ss:$0 sps:$4 sm:$0x11]   ;;  %v2415_v63 = vshrl.u32 %v4334_v58, 16  ;;  %v2417_v0 = vshll.u32 %v4334_v58, 16  ;;  %v2403_v3 = vshrl.u32 %v4336_v61, 16 }
  0x68   : > { %v1517_v51 = vor.u32 %v1516_v45, %v1512_v39  ;;  %v1504_v52 = vrot.slane %v1502_v48, 1  ;;  %v1509_v57 = vrot.slane %v1507_v53, 1  ;;  %v2422_v1 = vshll.u32 %v4335_v60, 16  ;;  %v4337_v2 = vld [vmem:[%s4958_s6 + $0x20] ss:$0 sps:$4 sm:$0x11]  }
  0x69   : > { %1982 = vrot.lane.b32.xlu1 %v1937_v35, %s4768_s23  ;;  %v618_v50 = vsel %vm594_vm1, %v613_v44, %v617_v42  ;;  %v2405_v4 = vshll.u32 %v4336_v61, 16  ;;  %v2419_v5 = vrot.slane %v2417_v0, 1  ;;  %v4338_v6 = vld [vmem:[%s4958_s6 + $0x18] sm:$0xff]   ;;  %s4772_s10 = smov 24   ;;  %v2410_v9 = vshll.u32 %v4337_v2, 16  ;;  %s4773_s11 = smov 28  }
  0x6a   : > { %789 = vrot.lane.b32.xlu0 %v618_v50, %s4770_s12  ;;  %v1522_v55 = vsel %vm594_vm1, %v1517_v51, %v1521_v49  ;;  %v1505_v56 = vor.u32 %v1504_v52, %v1500_v47  ;;  %v2424_v7 = vrot.slane %v2422_v1, 1  ;;  %v4339_v10 = vld [vmem:[%s4958_s6 + $0x20] ss:$0 sps:$4 sm:$0x11]   ;;  %v620_v12 = vshrl.u32 %v4338_v6, 16  ;;  %v4342_v26 = vld [vmem:[%s4958_s6 + $0x24] sm:$0xff]  }
  0x6b   : > { %v2407_v8 = vrot.slane %v2405_v4, 1  ;;  %v2420_v11 = vor.u32 %v2419_v5, %v2415_v63  ;;  %v622_v13 = vshll.u32 %v4338_v6, 16  ;;  %v2412_v15 = vrot.slane %v2410_v9, 1  ;;  %v4340_v17 = vld [vmem:[%s4958_s6 + $0x18] sm:$0xfe]   ;;  %s4774_s30 = smov 32  }
  0x6c   : > { %v1510_v62 = vsel %vm594_vm1, %v1505_v56, %v1509_v57  ;;  %v627_v16 = vshll.u32 %v4339_v10, 16  ;;  %v4341_v20 = vld [vmem:[%s4958_s6 + $0x20] ss:$0 sps:$4 sm:$0x11]   ;;  %v2835_v23 = vrot.slane %v4340_v17, 1  ;;  %v632_v30 = vshrl.u32 %v4342_v26, 16 }
  0x6d   : > { %1693 = vrot.lane.b32.xlu1 %v1522_v55, %s4771_s13  ;;  %v2408_v14 = vor.u32 %v2407_v8, %v2403_v3  ;;  %v2425_v18 = vsel %vm594_vm1, %v2420_v11, %v2424_v7  ;;  %v624_v19 = vrot.slane %v622_v13, 1  ;;  %v2836_v25 = vrot.slane %v4341_v20, 1  ;;  %v4343_v27 = vld [vmem:[%s4958_s6 + $0x2c] ss:$0 sps:$4 sm:$0x11]   ;;  %v4352_v43 = vld [vmem:[%s4958_s6 + $0x30] sm:$0xff]  }
  0x6e   : > { %1691 = vrot.lane.b32.xlu0 %v1510_v62, %s4771_s13  ;;  %v629_v22 = vrot.slane %v627_v16, 1  ;;  %v634_v31 = vshll.u32 %v4342_v26, 16  ;;  %v4344_v32 = vld [vmem:[%s4958_s6 + $0x24] sm:$0xfe]   ;;  %v639_v33 = vshll.u32 %v4343_v27, 16  ;;  %v1538_v51 = vshll.u32 %v4352_v43, 16 }
  0x6f   : > { %v2413_v21 = vsel %vm594_vm1, %v2408_v14, %v2412_v15  ;;  %v625_v24 = vor.u32 %v624_v19, %v620_v12  ;;  %v2837_v29 = vsel %vm1028_vm0, %v2835_v23, %v2836_v25  ;;  %v4345_v34 = vld [vmem:[%s4958_s6 + $0x2c] ss:$0 sps:$4 sm:$0x11]   ;;  %v2838_v36 = vrot.slane %v4344_v32, 1  ;;  %v4346_v37 = vld [vmem:[%s4958_s6 + $0x24] sm:$0xfe]  }
  0x70   : > { %v636_v35 = vrot.slane %v634_v31, 1  ;;  %v641_v38 = vrot.slane %v639_v33, 1  ;;  %v2839_v39 = vrot.slane %v4345_v34, 1  ;;  %v4347_v40 = vld [vmem:[%s4958_s6 + $0x2c] ss:$0 sps:$4 sm:$0x11]  }
  0x71   : > { %2163 = vrot.lane.b32.xlu1 %v4332_v54, %s4772_s10  ;;  %v630_v28 = vsel %vm594_vm1, %v625_v24, %v629_v22  ;;  %v1038_v42 = vrot.slane %v4346_v37, 1  ;;  %v1039_v45 = vrot.slane %v4347_v40, 1  ;;  %v4348_v46 = vld [vmem:[%s4958_s6 + $0x18] sm:$0xfe]   ;;  %v4354_v47 = vld [vmem:[%s4958_s6 + $0x24] sm:$0xff]   ;;  %v1536_v54 = vshrl.u32 %v4352_v43, 16 }
  0x72   : > { %2161 = vrot.lane.b32.xlu0 %v4333_v59, %s4772_s10  ;;  %v637_v41 = vor.u32 %v636_v35, %v632_v30  ;;  %v2840_v44 = vsel %vm1028_vm0, %v2838_v36, %v2839_v39  ;;  %v4349_v49 = vld [vmem:[%s4958_s6 + $0x20] ss:$0 sps:$4 sm:$0x11]   ;;  %v1035_v50 = vrot.slane %v4348_v46, 1  ;;  %v4350_v55 = vld [vmem:[%s4958_s6 + $0x30] sm:$0xff]   ;;  %v4351_v56 = vld [vmem:[%s4958_s6 + $0x24] sm:$0xff]  }
  0x73   : > { %v1040_v52 = vsel %vm1028_vm0, %v1038_v42, %v1039_v45  ;;  %v1036_v53 = vrot.slane %v4349_v49, 1  ;;  %v1540_v57 = vrot.slane %v1538_v51, 1  ;;  %v1526_v58 = vshll.u32 %v4354_v47, 16  ;;  %v4353_v60 = vld [vmem:[%s4958_s6 + $0x38] ss:$0 sps:$4 sm:$0x11]  }
  0x74   : > { %v642_v48 = vsel %vm594_vm1, %v637_v41, %v641_v38  ;;  %v1524_v61 = vshrl.u32 %v4354_v47, 16  ;;  %v1543_v0 = vshll.u32 %v4353_v60, 16  ;;  %v4355_v1 = vld [vmem:[%s4958_s6 + $0x2c] ss:$0 sps:$4 sm:$0x11]   ;;  %v4362_v13 = vld [vmem:[%s4958_s6 + $0x3c] sm:$0xff]  }
  0x75   : > { %2596 = vrot.lane.b32.xlu1 %v2425_v18, %s4773_s11  ;;  %v1037_v59 = vsel %vm1028_vm0, %v1035_v50, %v1036_v53  ;;  %v1528_v62 = vrot.slane %v1526_v58, 1  ;;  %v1541_v63 = vor.u32 %v1540_v57, %v1536_v54  ;;  %v4356_v2 = vld [vmem:[%s4958_s6 + $0x30] sm:$0xfe]   ;;  %v1531_v5 = vshll.u32 %v4355_v1, 16  ;;  %v4358_v11 = vld [vmem:[%s4958_s6 + $0x24] sm:$0xfe]  }
  0x76   : > { %2594 = vrot.lane.b32.xlu0 %v2413_v21, %s4773_s11  ;;  %v1545_v3 = vrot.slane %v1543_v0, 1  ;;  %v4357_v6 = vld [vmem:[%s4958_s6 + $0x38] ss:$0 sps:$4 sm:$0x11]   ;;  %v1941_v7 = vrot.slane %v4356_v2, 1  ;;  %v1938_v15 = vrot.slane %v4358_v11, 1 }
  0x77   : > { %v1529_v4 = vor.u32 %v1528_v62, %v1524_v61  ;;  %v1533_v9 = vrot.slane %v1531_v5, 1  ;;  %v1942_v10 = vrot.slane %v4357_v6, 1  ;;  %v4359_v12 = vld [vmem:[%s4958_s6 + $0x2c] ss:$0 sps:$4 sm:$0x11]   ;;  %v4364_v16 = vld [vmem:[%s4958_s6 + $0x30] sm:$0xff]  }
  0x78   : > { %v1546_v8 = vsel %vm594_vm1, %v1541_v63, %v1545_v3  ;;  %v1939_v17 = vrot.slane %v4359_v12, 1  ;;  %v2439_v18 = vshrl.u32 %v4362_v13, 16  ;;  %v2441_v20 = vshll.u32 %v4362_v13, 16  ;;  %v4360_v23 = vld [vmem:[%s4958_s6 + $0x3c] sm:$0xff]   ;;  %v4366_v27 = vld [vmem:[%s4958_s6 + $0x30] sm:$0xff]   ;;  %s3628_s7 = sshll.u32 %s4954_s28, 8 }
  0x79   : > { %791 = vrot.lane.b32.xlu1 %v630_v28, %s4770_s12  ;;  %v1534_v14 = vsel %vm594_vm1, %v1529_v4, %v1533_v9  ;;  %v1943_v19 = vsel %vm1028_vm0, %v1941_v7, %v1942_v10  ;;  %v2427_v21 = vshrl.u32 %v4364_v16, 16  ;;  %v4363_v24 = vld [vmem:[%s4958_s6 + $0x44] ss:$0 sps:$4 sm:$0x11]   ;;  %v2429_v25 = vshll.u32 %v4364_v16, 16  ;;  %v4361_v28 = vld [vmem:[%s4958_s6 + $0x30] sm:$0xff]  }
  0x7a   : > { %2883 = vrot.lane.b32.xlu0 %v2837_v29, %s4774_s30  ;;  %v1940_v22 = vsel %vm1028_vm0, %v1938_v15, %v1939_v17  ;;  %v2443_v26 = vrot.slane %v2441_v20, 1  ;;  %v2446_v29 = vshll.u32 %v4363_v24, 16  ;;  %v4365_v30 = vld [vmem:[%s4958_s6 + $0x38] ss:$0 sps:$4 sm:$0x11]   ;;  %v4372_v37 = vld [vmem:[%s4958_s6 + $0x60] sm:$0xff]  }
  0x7b   : > { %v2431_v31 = vrot.slane %v2429_v25, 1  ;;  %v2434_v35 = vshll.u32 %v4365_v30, 16  ;;  %v4367_v36 = vld [vmem:[%s4958_s6 + $0x38] ss:$0 sps:$4 sm:$0x11]   ;;  %v644_v38 = vshrl.u32 %v4366_v27, 16 }
  0x7c   : > { %v2444_v32 = vor.u32 %v2443_v26, %v2439_v18  ;;  %v2448_v33 = vrot.slane %v2446_v29, 1  ;;  %v646_v39 = vshll.u32 %v4366_v27, 16  ;;  %v651_v41 = vshll.u32 %v4367_v36, 16  ;;  %v4368_v42 = vld [vmem:[%s4958_s6 + $0x30] sm:$0xfe]   ;;  %v4376_v5 = vld [vmem:[%s4958_s6 + $0x3c] sm:$0xff]  }
  0x7d   : > { %793 = vrot.lane.b32.xlu1 %v642_v48, %s4770_s12  ;;  %v2432_v34 = vor.u32 %v2431_v31, %v2427_v21  ;;  %v2436_v40 = vrot.slane %v2434_v35, 1  ;;  %v4369_v45 = vld [vmem:[%s4958_s6 + $0x38] ss:$0 sps:$4 sm:$0x11]   ;;  %v2841_v48 = vrot.slane %v4368_v42, 1  ;;  %v692_v53 = vshrl.u32 %v4372_v37, 16 }
  0x7e   : > { %2885 = vrot.lane.b32.xlu0 %v2840_v44, %s4774_s30  ;;  %v2449_v43 = vsel %vm594_vm1, %v2444_v32, %v2448_v33  ;;  %v648_v44 = vrot.slane %v646_v39, 1  ;;  %v653_v47 = vrot.slane %v651_v41, 1  ;;  %v2842_v50 = vrot.slane %v4369_v45, 1  ;;  %v4370_v51 = vld [vmem:[%s4958_s6 + $0x3c] sm:$0xfe]   ;;  %v4374_v61 = vld [vmem:[%s4958_s6 + $0x6c] sm:$0xff]  }
  0x7f   : > { %v2437_v46 = vsel %vm594_vm1, %v2432_v34, %v2436_v40  ;;  %v694_v54 = vshll.u32 %v4372_v37, 16  ;;  %v2844_v57 = vrot.slane %v4370_v51, 1  ;;  %v4375_v62 = vld [vmem:[%s4958_s6 + $0x74] ss:$0 sps:$4 sm:$0x11]   ;;  %v704_v2 = vshrl.u32 %v4374_v61, 16 }
  0x80   : > { %v649_v49 = vor.u32 %v648_v44, %v644_v38  ;;  %v706_v3 = vshll.u32 %v4374_v61, 16  ;;  %v711_v4 = vshll.u32 %v4375_v62, 16  ;;  %v4377_v7 = vld [vmem:[%s4958_s6 + $0x44] ss:$0 sps:$4 sm:$0x11]   ;;  %v656_v10 = vshrl.u32 %v4376_v5, 16 }
  0x81   : > { %1083 = vrot.lane.b32.xlu1 %v1040_v52, %s4769_s25  ;;  %v4371_v52 = vld [vmem:[%s4958_s6 + $0x44] ss:$0 sps:$4 sm:$0x11]   ;;  %v696_v60 = vrot.slane %v694_v54, 1  ;;  %v658_v11 = vshll.u32 %v4376_v5, 16  ;;  %v663_v13 = vshll.u32 %v4377_v7, 16 }
  0x82   : > { %1081 = vrot.lane.b32.xlu0 %v1037_v59, %s4769_s25  ;;  %v2845_v58 = vrot.slane %v4371_v52, 1  ;;  %v4373_v59 = vld [vmem:[%s4958_s6 + $0x68] ss:$0 sps:$4 sm:$0x11]   ;;  %v713_v9 = vrot.slane %v711_v4, 1  ;;  %v4386_v39 = vld [vmem:[%s4958_s6 + $0x6c] sm:$0xff]  }
  0x83   : > { %v697_v63 = vor.u32 %v696_v60, %v692_v53  ;;  %v699_v0 = vshll.u32 %v4373_v59, 16  ;;  %v660_v16 = vrot.slane %v658_v11, 1  ;;  %v4379_v17 = vld [vmem:[%s4958_s6 + $0x68] ss:$0 sps:$4 sm:$0x11]   ;;  %v665_v18 = vrot.slane %v663_v13, 1 }
  0x84   : > { %v2846_v1 = vsel %vm1028_vm0, %v2844_v57, %v2845_v58  ;;  %v4381_v24 = vld [vmem:[%s4958_s6 + $0x38] ss:$0 sps:$4 sm:$0x11]   ;;  %v4382_v29 = vld [vmem:[%s4958_s6 + $0x6c] sm:$0xfe]   ;;  %v4387_v42 = vld [vmem:[%s4958_s6 + $0x3c] sm:$0xff]  }
  0x85   : > { %1264 = vrot.lane.b32.xlu1 %v4350_v55, %s4767_s22  ;;  %v654_v55 = vsel %vm594_vm1, %v649_v49, %v653_v47  ;;  %v701_v6 = vrot.slane %v699_v0, 1  ;;  %v661_v21 = vor.u32 %v660_v16, %v656_v10  ;;  %v4383_v30 = vld [vmem:[%s4958_s6 + $0x74] ss:$0 sps:$4 sm:$0x11]   ;;  %v1056_v32 = vrot.slane %v4382_v29, 1  ;;  %v4390_v40 = vld [vmem:[%s4958_s6 + $0x6c] sm:$0xff]  }
  0x86   : > { %1262 = vrot.lane.b32.xlu0 %v4351_v56, %s4767_s22  ;;  %v2843_v56 = vsel %vm1028_vm0, %v2841_v48, %v2842_v50  ;;  %v4384_v33 = vld [vmem:[%s4958_s6 + $0x3c] sm:$0xfe]   ;;  %v1057_v34 = vrot.slane %v4383_v30, 1  ;;  %v4385_v35 = vld [vmem:[%s4958_s6 + $0x44] ss:$0 sps:$4 sm:$0x11]  }
  0x87   : > { %v702_v12 = vsel %vm594_vm1, %v697_v63, %v701_v6  ;;  %v666_v25 = vsel %vm594_vm1, %v661_v21, %v665_v18  ;;  %v1044_v36 = vrot.slane %v4384_v33, 1  ;;  %v1045_v38 = vrot.slane %v4385_v35, 1  ;;  %v4388_v47 = vld [vmem:[%s4958_s6 + $0x78] sm:$0xff]   ;;  %v4393_v50 = vld [vmem:[%s4958_s6 + $0x44] ss:$0 sps:$4 sm:$0x11]  }
  0x88   : > { %v1058_v37 = vsel %vm1028_vm0, %v1056_v32, %v1057_v34  ;;  %v1596_v44 = vshrl.u32 %v4390_v40, 16  ;;  %v1598_v45 = vshll.u32 %v4390_v40, 16  ;;  %v4389_v52 = vld [vmem:[%s4958_s6 + $0x48] sm:$0xff]   ;;  %v4394_v54 = vld [vmem:[%s4958_s6 + $0x78] sm:$0xff]   ;;  %v1555_v57 = vshll.u32 %v4393_v50, 16  ;;  %s5597_s9 = scalar_lea.vmem [#allocation8], %s3628_s7 }
  0x89   : > { %1697 = vrot.lane.b32.xlu1 %v1546_v8, %s4771_s13  ;;  %v708_v8 = vrot.slane %v706_v3, 1  ;;  %v1046_v41 = vsel %vm1028_vm0, %v1044_v36, %v1045_v38  ;;  %v4395_v59 = vld [vmem:[%s4958_s6 + $0x80] ss:$0 sps:$4 sm:$0x11]   ;;  %v1608_v60 = vshrl.u32 %v4394_v54, 16  ;;  %v1610_v61 = vshll.u32 %v4394_v54, 16 }
  0x8a   : > { %1695 = vrot.lane.b32.xlu0 %v1534_v14, %s4771_s13  ;;  %v4378_v14 = vld [vmem:[%s4958_s6 + $0x60] sm:$0xfe]   ;;  %v1600_v48 = vrot.slane %v1598_v45, 1  ;;  %v1557_v62 = vrot.slane %v1555_v57, 1  ;;  %v4396_v63 = vld [vmem:[%s4958_s6 + $0x48] sm:$0xff]   ;;  %v4410_v34 = vld [vmem:[%s4958_s6 + $0x78] sm:$0xff]  }
  0x8b   : > { %v709_v15 = vor.u32 %v708_v8, %v704_v2  ;;  %v1615_v2 = vshll.u32 %v4395_v59, 16  ;;  %v4397_v3 = vld [vmem:[%s4958_s6 + $0x50] ss:$0 sps:$4 sm:$0x11]   ;;  %v1560_v5 = vshrl.u32 %v4396_v63, 16  ;;  %v1562_v6 = vshll.u32 %v4396_v63, 16 }
  0x8c   : > { %v4398_v10 = vld [vmem:[%s4958_s6 + $0x6c] sm:$0xfe]   ;;  %v4399_v13 = vld [vmem:[%s4958_s6 + $0x74] ss:$0 sps:$4 sm:$0x11]   ;;  %vm401_vm2 = vcmask 31744  }
  0x8d   : > { %1986 = vrot.lane.b32.xlu1 %v1943_v19, %s4768_s23  ;;  %v1053_v19 = vrot.slane %v4378_v14, 1  ;;  %v714_v20 = vsel %vm594_vm1, %v709_v15, %v713_v9  ;;  %v1617_v8 = vrot.slane %v1615_v2, 1  ;;  %v1567_v9 = vshll.u32 %v4397_v3, 16  ;;  %v4405_v30 = vld [vmem:[%s4958_s6 + $0x50] ss:$0 sps:$4 sm:$0x11]  }
  0x8e   : > { %1984 = vrot.lane.b32.xlu0 %v1940_v22, %s4768_s23  ;;  %v1054_v22 = vrot.slane %v4379_v17, 1  ;;  %v1956_v15 = vrot.slane %v4398_v10, 1  ;;  %v1957_v18 = vrot.slane %v4399_v13, 1  ;;  %v1948_v33 = vrot.slane %v4405_v30, 1  ;;  %v4406_v36 = vld [vmem:[%s4958_s6 + $0x78] sm:$0xff]   ;;  %v4422_v63 = vld [vmem:[%s4958_s6] sm:$0xff]  }
  0x8f   : > { %v1569_v14 = vrot.slane %v1567_v9, 1  ;;  %v4411_v38 = vld [vmem:[%s4958_s6 + $0x80] ss:$0 sps:$4 sm:$0x11]   ;;  %v2501_v40 = vshll.u32 %v4410_v34, 16  ;;  %v4416_v59 = vld [vmem:[%s4958_s6 + $0x54] sm:$0xff]  }
  0x90   : > { %v1055_v26 = vsel %vm1028_vm0, %v1053_v19, %v1054_v22  ;;  %v4400_v19 = vld [vmem:[%s4958_s6 + $0x3c] sm:$0xfe]   ;;  %v4413_v45 = vld [vmem:[%s4958_s6 + $0x50] ss:$0 sps:$4 sm:$0x11]   ;;  %v2465_v2 = vshll.u32 %v4416_v59, 16 }
  0x91   : > { %2167 = vrot.lane.b32.xlu1 %v4360_v23, %s4772_s10  ;;  %v4380_v23 = vld [vmem:[%s4958_s6 + $0x30] sm:$0xfe]   ;;  %v1944_v22 = vrot.slane %v4400_v19, 1  ;;  %v4415_v54 = vld [vmem:[%s4958_s6 + $0x8c] ss:$0 sps:$4 sm:$0x11]  }
  0x92   : > { %2165 = vrot.lane.b32.xlu0 %v4361_v28, %s4772_s10  ;;  %v1041_v27 = vrot.slane %v4380_v23, 1  ;;  %v1042_v28 = vrot.slane %v4381_v24, 1  ;;  %v4402_v24 = vld [vmem:[%s4958_s6 + $0x78] sm:$0xfe]   ;;  %402 = vst.msk [vmem:[#allocation2] sm:$0xff] %vm401_vm2, %v4422_v63  ;;  %v2467_v10 = vrot.slane %v2465_v2, 1 }
  0x93   : > { %vm835_vm3 = vcmask 64544   ;;  %vm1125_vm4 = vcmask 97344   ;;  %vm1306_vm5 = vcmask 130144   ;;  %vm1739_vm6 = vcmask 162944   ;;  %s4151_s14 = sshll.u32 %s4753_s18, 12  ;;  %s3433_s27 = sshll.u32 %s5597_s9, 4  ;;  %s5731_s27 = int_to_ptr.vmem [resolvable:$true] %s3433_s27 }
  0x94   : > { %v1043_v31 = vsel %vm1028_vm0, %v1041_v27, %v1042_v28  ;;  %v1959_v27 = vrot.slane %v4402_v24, 1  ;;  %v4404_v28 = vld [vmem:[%s4958_s6 + $0x48] sm:$0xfe]   ;;  %vm2028_vm7 = vcmask 195744   ;;  %vm2209_vm8 = vcmask 228544  }
  0x95   : > { %2600 = vrot.lane.b32.xlu1 %v2449_v43, %s4773_s11  ;;  %v4391_v43 = vld [vmem:[%s4958_s6 + $0x74] ss:$0 sps:$4 sm:$0x11]   ;;  %v1947_v32 = vrot.slane %v4404_v28, 1  ;;  %vm2642_vm9 = vcmask 261344   ;;  %vm2931_vm10 = vcmask 294144  }
  0x96   : > { %2598 = vrot.lane.b32.xlu0 %v2437_v46, %s4773_s11  ;;  %v4392_v46 = vld [vmem:[%s4958_s6 + $0x3c] sm:$0xff]   ;;  %v1603_v49 = vshll.u32 %v4391_v43, 16  ;;  %v2503_v43 = vrot.slane %v2501_v40, 1  ;;  %vm3033_vm11 = vcmask 1041408   ;;  %vm2984_vm12 = vcmask 293888  }
  0x97   : > { %v1548_v51 = vshrl.u32 %v4392_v46, 16  ;;  %v1550_v53 = vshll.u32 %v4392_v46, 16  ;;  %vm3198_vm13 = vcmask 261120  }
  0x99   : > { %795 = vrot.lane.b32.xlu1 %v654_v55, %s4770_s12  ;;  %v1601_v55 = vor.u32 %v1600_v48, %v1596_v44  ;;  %v1552_v58 = vrot.slane %v1550_v53, 1  ;;  %v2506_v44 = vshll.u32 %v4411_v38, 16  ;;  %v4427_v38 = vld [vmem:[%s4958_s6 + $0xc] sm:$0xff]  }
  0x9a   : > { %2887 = vrot.lane.b32.xlu0 %v2843_v56, %s4774_s30  ;;  %v1605_v56 = vrot.slane %v1603_v49, 1  ;;  %v4414_v49 = vld [vmem:[%s4958_s6 + $0x84] sm:$0xff]   ;;  %403 = vst.msk [vmem:[#allocation2 + $0x8] sm:$0xff] %vm401_vm2, %v4427_v38 }
  0x9b   : > { %v1553_v0 = vor.u32 %v1552_v58, %v1548_v51  ;;  %v2508_v50 = vrot.slane %v2506_v44, 1  ;;  %v2458_v51 = vshll.u32 %v4413_v45, 16  ;;  %v4428_v45 = vld [vmem:[%s4958_s6 + $0x84] sm:$0xfe]  }
  0x9c   : > { %v1606_v4 = vsel %vm594_vm1, %v1601_v55, %v1605_v56  ;;  %v2511_v55 = vshrl.u32 %v4414_v49, 16  ;;  %v2513_v56 = vshll.u32 %v4414_v49, 16 }
  0x9d   : > { %2889 = vrot.lane.b32.xlu1 %v2846_v1, %s4774_s30  ;;  %v1612_v1 = vrot.slane %v1610_v61, 1  ;;  %v1558_v11 = vsel %vm594_vm1, %v1553_v0, %v1557_v62  ;;  %v2460_v58 = vrot.slane %v2458_v51, 1  ;;  %v2518_v61 = vshll.u32 %v4415_v54, 16  ;;  %v4417_v62 = vld [vmem:[%s4958_s6 + $0x5c] ss:$0 sps:$4 sm:$0x11]  }
  0x9e   : > { %803 = vrot.lane.b32.xlu0 %v702_v12, %s4770_s12  ;;  %v1564_v12 = vrot.slane %v1562_v6, 1 }
  0x9f   : > { %v1613_v7 = vor.u32 %v1612_v1, %v1608_v60  ;;  %v2515_v60 = vrot.slane %v2513_v56, 1  ;;  %v2463_v1 = vshrl.u32 %v4416_v59, 16  ;;  %v2520_v3 = vrot.slane %v2518_v61, 1 }
  0xa0   : > { %v1565_v17 = vor.u32 %v1564_v12, %v1560_v5  ;;  %v4418_v5 = vld [vmem:[%s4958_s6 + $0x78] sm:$0xfe]  }
  0xa1   : > { %805 = vrot.lane.b32.xlu1 %v714_v20, %s4770_s12  ;;  %v1618_v16 = vsel %vm594_vm1, %v1613_v7, %v1617_v8  ;;  %v4401_v20 = vld [vmem:[%s4958_s6 + $0x44] ss:$0 sps:$4 sm:$0x11]   ;;  %v2516_v9 = vor.u32 %v2515_v60, %v2511_v55  ;;  %v4431_v55 = vld [vmem:[%s4958_s6 + $0x5c] ss:$0 sps:$4 sm:$0x11]  }
  0xa2   : > { %797 = vrot.lane.b32.xlu0 %v666_v25, %s4770_s12  ;;  %v1570_v21 = vsel %vm594_vm1, %v1565_v17, %v1569_v14  ;;  %v1945_v23 = vrot.slane %v4401_v20, 1  ;;  %v4403_v25 = vld [vmem:[%s4958_s6 + $0x80] ss:$0 sps:$4 sm:$0x11]   ;;  %v2468_v14 = vor.u32 %v2467_v10, %v2463_v1  ;;  %v2851_v60 = vrot.slane %v4431_v55, 1 }
  0xa3   : > { %v1960_v29 = vrot.slane %v4403_v25, 1  ;;  %v4421_v17 = vld [vmem:[%s4958_s6 + $0x50] ss:$0 sps:$4 sm:$0x11]  }
  0xa4   : > { %v4454_v55 = vld [vmem:[%s4958_s6 + $0x8c] ss:$0 sps:$4 sm:$0x11]  }
  0xa5   : > { %1093 = vrot.lane.b32.xlu1 %v1055_v26, %s4769_s25  ;;  %v1958_v26 = vsel %vm1028_vm0, %v1956_v15, %v1957_v18  ;;  %v1961_v35 = vsel %vm1028_vm0, %v1959_v27, %v1960_v29  ;;  %v2859_v15 = vrot.slane %v4418_v5, 1  ;;  %v2521_v18 = vsel %vm594_vm1, %v2516_v9, %v2520_v3  ;;  %v4425_v27 = vld [vmem:[%s4958_s6 + $0x48] sm:$0xff]   ;;  %v4435_v3 = vld [vmem:[%s4958_s6 + $0x5c] ss:$0 sps:$4 sm:$0x11]  }
  0xa6   : > { %1085 = vrot.lane.b32.xlu0 %v1043_v31, %s4769_s25  ;;  %v1946_v31 = vsel %vm1028_vm0, %v1944_v22, %v1945_v23  ;;  %v4424_v22 = vld [vmem:[%s4958_s6 + $0x80] ss:$0 sps:$4 sm:$0x11]   ;;  %v4444_v9 = vld [vmem:[%s4958_s6 + $0x18] sm:$0xff]  }
  0xa7   : > { %v723_v30 = vshll.u32 %v4424_v22, 16  ;;  %404 = vst.msk [vmem:[#allocation2 + $0x10] sm:$0xff] %vm401_vm2, %v4444_v9  ;;  %v4439_v22 = vld [vmem:[%s4958_s6 + $0x50] ss:$0 sps:$4 sm:$0x11]  }
  0xa9   : > { %1095 = vrot.lane.b32.xlu1 %v1058_v37, %s4769_s25  ;;  %v1949_v37 = vsel %vm1028_vm0, %v1947_v32, %v1948_v33  ;;  %v668_v33 = vshrl.u32 %v4425_v27, 16 }
  0xaa   : > { %1087 = vrot.lane.b32.xlu0 %v1046_v41, %s4769_s25  ;;  %v4412_v41 = vld [vmem:[%s4958_s6 + $0x48] sm:$0xff]  }
  0xab   : > { %v2451_v46 = vshrl.u32 %v4412_v41, 16  ;;  %v2453_v48 = vshll.u32 %v4412_v41, 16 }
  0xad   : > { %1274 = vrot.lane.b32.xlu1 %v4386_v39, %s4767_s22  ;;  %v2499_v39 = vshrl.u32 %v4410_v34, 16  ;;  %v2455_v53 = vrot.slane %v2453_v48, 1  ;;  %v670_v34 = vshll.u32 %v4425_v27, 16 }
  0xae   : > { %1266 = vrot.lane.b32.xlu0 %v4387_v42, %s4767_s22  ;;  %v4407_v42 = vld [vmem:[%s4958_s6 + $0x48] sm:$0xff]  }
  0xaf   : > { %v2504_v57 = vor.u32 %v2503_v43, %v2499_v39  ;;  %v2456_v0 = vor.u32 %v2455_v53, %v2451_v46  ;;  %v672_v41 = vrot.slane %v670_v34, 1  ;;  %v4429_v46 = vld [vmem:[%s4958_s6 + $0x8c] ss:$0 sps:$4 sm:$0x11]   ;;  %v4442_v34 = vld [vmem:[%s4958_s6 + $0x54] sm:$0xfe]  }
  0xb0   : > { %v2863_v51 = vrot.slane %v4429_v46, 1  ;;  %v1050_v38 = vrot.slane %v4442_v34, 1  ;;  %v4449_v46 = vld [vmem:[#allocation6 + $0x8] sm:$0xff]  }
  0xb1   : > { %1276 = vrot.lane.b32.xlu1 %v4388_v47, %s4767_s22  ;;  %v4408_v47 = vld [vmem:[%s4958_s6 + $0x84] sm:$0xff]   ;;  %v2509_v6 = vsel %vm594_vm1, %v2504_v57, %v2508_v50  ;;  %v2461_v13 = vsel %vm594_vm1, %v2456_v0, %v2460_v58  ;;  %v673_v48 = vor.u32 %v672_v41, %v668_v33  ;;  %v2862_v50 = vrot.slane %v4428_v45, 1  ;;  %v4433_v58 = vld [vmem:[%s4958_s6 + $0x8c] ss:$0 sps:$4 sm:$0x11]   ;;  %v4434_v0 = vld [vmem:[%s4958_s6 + $0x54] sm:$0xff]  }
  0xb2   : > { %1268 = vrot.lane.b32.xlu0 %v4389_v52, %s4767_s22  ;;  %v4409_v52 = vld [vmem:[%s4958_s6 + $0x54] sm:$0xff]   ;;  %v735_v63 = vshll.u32 %v4433_v58, 16 }
  0xb3   : > { %v2864_v59 = vsel %vm1028_vm0, %v2862_v50, %v2863_v51  ;;  %v4452_v50 = vld [vmem:[#allocation6 + $0x10] ss:$0 sps:$4 sm:$0x33]   ;;  %v4455_v58 = vld [vmem:[%s4958_s6 + $0x54] sm:$0xff]  }
  0xb4   : > { %v737_v5 = vrot.slane %v735_v63, 1  ;;  %v4453_v51 = vld [vmem:[%s4958_s6 + $0x84] sm:$0xff]  }
  0xb5   : > { %1707 = vrot.lane.b32.xlu1 %v1606_v4, %s4771_s13  ;;  %v2470_v4 = vshll.u32 %v4417_v62, 16 }
  0xb6   : > { %1699 = vrot.lane.b32.xlu0 %v1558_v11, %s4771_s13  ;;  %v4419_v11 = vld [vmem:[%s4958_s6 + $0x80] ss:$0 sps:$4 sm:$0x11]  }
  0xb7   : > { %v2472_v12 = vrot.slane %v2470_v4, 1  ;;  %v2860_v19 = vrot.slane %v4419_v11, 1  ;;  %v687_v11 = vshll.u32 %v4435_v3, 16  ;;  %v1574_v3 = vshll.u32 %v4455_v58, 16 }
  0xb9   : > { %1709 = vrot.lane.b32.xlu1 %v1618_v16, %s4771_s13  ;;  %v4420_v16 = vld [vmem:[%s4958_s6 + $0x48] sm:$0xfe]   ;;  %v2473_v23 = vsel %vm594_vm1, %v2468_v14, %v2472_v12  ;;  %v2861_v32 = vsel %vm1028_vm0, %v2859_v15, %v2860_v19  ;;  %v4436_v12 = vld [vmem:[%s4958_s6 + $0x78] sm:$0xfe]   ;;  %v1576_v9 = vrot.slane %v1574_v3, 1 }
  0xba   : > { %1701 = vrot.lane.b32.xlu0 %v1570_v21, %s4771_s13  ;;  %v2847_v20 = vrot.slane %v4420_v16, 1  ;;  %v4423_v21 = vld [vmem:[%s4958_s6 + $0x78] sm:$0xff]   ;;  %v4437_v15 = vld [vmem:[%s4958_s6 + $0x80] ss:$0 sps:$4 sm:$0x11]  }
  0xbb   : > { %v716_v28 = vshrl.u32 %v4423_v21, 16  ;;  %v718_v29 = vshll.u32 %v4423_v21, 16  ;;  %v4438_v21 = vld [vmem:[%s4958_s6 + $0x48] sm:$0xfe]  }
  0xbc   : > { %v1047_v27 = vrot.slane %v4438_v21, 1 }
  0xbd   : > { %1996 = vrot.lane.b32.xlu1 %v1958_v26, %s4768_s23  ;;  %v2848_v26 = vrot.slane %v4421_v17, 1  ;;  %v1059_v17 = vrot.slane %v4436_v12, 1 }
  0xbe   : > { %1988 = vrot.lane.b32.xlu0 %v1946_v31, %s4768_s23  ;;  %v4426_v31 = vld [vmem:[%s4958_s6 + $0x50] ss:$0 sps:$4 sm:$0x11]  }
  0xbf   : > { %v2849_v39 = vsel %vm1028_vm0, %v2847_v20, %v2848_v26  ;;  %v1060_v20 = vrot.slane %v4437_v15, 1 }
  0xc1   : > { %1998 = vrot.lane.b32.xlu1 %v1961_v35, %s4768_s23  ;;  %v720_v35 = vrot.slane %v718_v29, 1  ;;  %v1061_v26 = vsel %vm1028_vm0, %v1059_v17, %v1060_v20  ;;  %v4440_v29 = vld [vmem:[%s4958_s6 + $0x84] sm:$0xfe]  }
  0xc2   : > { %1990 = vrot.lane.b32.xlu0 %v1949_v37, %s4768_s23  ;;  %v675_v37 = vshll.u32 %v4426_v31, 16  ;;  %v1062_v33 = vrot.slane %v4440_v29, 1  ;;  %v4461_v29 = vld [vmem:[%s4958_s6 + $0x84] sm:$0xfe]  }
  0xc3   : > { %v721_v43 = vor.u32 %v720_v35, %v716_v28  ;;  %v1048_v28 = vrot.slane %v4439_v22, 1  ;;  %v4460_v22 = vld [vmem:[%s4958_s6 + $0x68] ss:$0 sps:$4 sm:$0x11]  }
  0xc4   : > { %v677_v44 = vrot.slane %v675_v37, 1 }
  0xc5   : > { %2177 = vrot.lane.b32.xlu1 %v4406_v36, %s4772_s10  ;;  %v725_v36 = vrot.slane %v723_v30, 1  ;;  %v4445_v30 = vld [vmem:[#allocation6] sm:$0xff]   ;;  %v1049_v31 = vsel %vm1028_vm0, %v1047_v27, %v1048_v28  ;;  %v1591_v28 = vshll.u32 %v4460_v22, 16 }
  0xc6   : > { %2169 = vrot.lane.b32.xlu0 %v4407_v42, %s4772_s10  ;;  %v4432_v42 = vld [vmem:[%s4958_s6 + $0x84] sm:$0xff]   ;;  %v678_v53 = vsel %vm594_vm1, %v673_v48, %v677_v44  ;;  %4171 = vmatprep.subr.bf16.mxu0 %v4445_v30  ;;  %v4450_v48 = vld [vmem:[%s4958_s6 + $0x90] sm:$0xff]  }
  0xc7   : > { %v726_v49 = vsel %vm594_vm1, %v721_v43, %v725_v36  ;;  %v728_v56 = vshrl.u32 %v4432_v42, 16  ;;  %v730_v61 = vshll.u32 %v4432_v42, 16  ;;  %v4443_v36 = vld [vmem:[%s4958_s6 + $0x5c] ss:$0 sps:$4 sm:$0x11]   ;;  %4209 = vmatprep.subr.bf16.mxu1 %v4445_v30  ;;  %4172 = vmatpush3.bf16.msra.mxu0 %v4445_v30  ;;  %v4448_v42 = vld [vmem:[%s4958_s6 + $0x24] sm:$0xff]  }
  0xc8   : > { %4212 = vmatpush3.bf16.msra.mxu1 %v4445_v30  ;;  %v1051_v41 = vrot.slane %v4443_v36, 1  ;;  %405 = vst.msk [vmem:[#allocation2 + $0x18] sm:$0xff] %vm401_vm2, %v4448_v42  ;;  %4173 = vmatprep.subr.bf16.mxu0 %v4449_v46  ;;  %v1593_v34 = vrot.slane %v1591_v28, 1 }
  0xc9   : > { %2179 = vrot.lane.b32.xlu1 %v4408_v47, %s4772_s10  ;;  %v732_v2 = vrot.slane %v730_v61, 1  ;;  %4210 = vmatprep.subr.bf16.mxu1 %v4449_v46  ;;  %v4456_v61 = vld [vmem:[%s4958_s6 + $0x5c] ss:$0 sps:$4 sm:$0x11]  }
  0xca   : > { %2171 = vrot.lane.b32.xlu0 %v4409_v52, %s4772_s10  ;;  %v4430_v52 = vld [vmem:[%s4958_s6 + $0x54] sm:$0xfe]   ;;  %v1052_v44 = vsel %vm1028_vm0, %v1050_v38, %v1051_v41  ;;  %v4464_v38 = vld [vmem:[%s4958_s6 + $0x5c] ss:$0 sps:$4 sm:$0x11]  }
  0xcb   : > { %v2850_v57 = vrot.slane %v4430_v52, 1  ;;  %v733_v10 = vor.u32 %v732_v2, %v728_v56  ;;  %4174 = vmatpush3.bf16.msra.mxu0 %v4449_v46  ;;  %v1620_v56 = vshrl.u32 %v4453_v51, 16  ;;  %v1572_v2 = vshrl.u32 %v4455_v58, 16  ;;  %v4474_v58 = vld [vmem:[%s4958_s6 + $0x90] sm:$0xff]  }
  0xcc   : > { %4213 = vmatpush3.bf16.msra.mxu1 %v4449_v46  ;;  %4215 = vmatprep.subr.msk.bf16.mxu0 %vm3033_vm11, %v4452_v50  ;;  %v1951_v42 = vrot.slane %v4464_v38, 1  ;;  %v4466_v46 = vld [vmem:[%s4958_s6 + $0x98] ss:$0 sps:$4 sm:$0x11]   ;;  %v2523_v3 = vshrl.u32 %v4474_v58, 16 }
  0xcd   : > { %v5171_v7 = vpop.permute.xlu1 %1260  ;;  %v5173_v8 = vpop.permute.xlu0 %1258  ;;  %2610 = vrot.lane.b32.xlu1 %v2509_v6, %s4773_s11  ;;  %v2852_v1 = vsel %vm1028_vm0, %v2850_v57, %v2851_v60  ;;  %v680_v6 = vshrl.u32 %v4434_v0, 16  ;;  %v738_v16 = vsel %vm594_vm1, %v733_v10, %v737_v5  ;;  %v1622_v57 = vshll.u32 %v4453_v51, 16  ;;  %4216 = vmatprep.subr.msk.bf16.mxu1 %vm3033_vm11, %v4452_v50  ;;  %v4458_v10 = vld [vmem:[%s4958_s6 + $0x98] ss:$0 sps:$4 sm:$0x11]  }
  0xce   : > { %2602 = vrot.lane.b32.xlu0 %v2461_v13, %s4773_s11  ;;  %v1627_v60 = vshll.u32 %v4454_v55, 16  ;;  %v1639_v20 = vshll.u32 %v4458_v10, 16  ;;  %v4468_v51 = vld [vmem:[%s4958_s6 + $0x68] ss:$0 sps:$4 sm:$0x11]  }
  0xd1   : > { %2612 = vrot.lane.b32.xlu1 %v2521_v18, %s4773_s11 }
  0xd2   : > { %v5186_v24 = vpop.permute.xlu0 %1980  ;;  %2604 = vrot.lane.b32.xlu0 %v2473_v23, %s4773_s11 }
  0xd3   : > { %v1078_v25 = vpop.permute.xlu1 %1077 }
  0xd5   : > { %2899 = vrot.lane.b32.xlu1 %v2861_v32, %s4774_s30 }
  0xd6   : > { %2891 = vrot.lane.b32.xlu0 %v2849_v39, %s4774_s30  ;;  %v4446_v39 = vld [vmem:[%s4958_s6 + $0x84] sm:$0xff]  }
  0xd7   : > { %v1080_v40 = vpop.permute.xlu1 %1079 }
  0xd8   : > { %v788_v47 = vpop.permute.xlu0 %787 }
  0xd9   : > { %836 = vst.msk [vmem:[#allocation2] sm:$0xff] %vm835_vm3, %v788_v47  ;;  %807 = vrot.lane.b32.xlu1 %v726_v49, %s4770_s12  ;;  %v4447_v47 = vld [vmem:[%s4958_s6 + $0x54] sm:$0xff]   ;;  %v4451_v49 = vld [vmem:[%s4958_s6 + $0x60] sm:$0xff]  }
  0xda   : > { %1126 = vst.msk [vmem:[#allocation2] sm:$0xff] %vm1125_vm4, %v1078_v25  ;;  %799 = vrot.lane.b32.xlu0 %v678_v53, %s4770_s12 }
  0xdb   : > { %v1983_v54 = vpop.permute.xlu1 %1982  ;;  %1307 = vst.msk [vmem:[#allocation2] sm:$0xff] %vm1306_vm5, %v5173_v8  ;;  %v682_v8 = vshll.u32 %v4434_v0, 16 }
  0xdc   : > { %v790_v62 = vpop.permute.xlu0 %789 }
  0xdd   : > { %837 = vst.msk [vmem:[#allocation2 + $0x8] sm:$0xff] %vm835_vm3, %v790_v62  ;;  %2901 = vrot.lane.b32.xlu1 %v2864_v59, %s4774_s30  ;;  %v684_v14 = vrot.slane %v682_v8, 1  ;;  %v1624_v59 = vrot.slane %v1622_v57, 1  ;;  %v4457_v62 = vld [vmem:[%s4958_s6 + $0x90] sm:$0xff]   ;;  %v1579_v8 = vshll.u32 %v4456_v61, 16  ;;  %v4470_v61 = vld [vmem:[%s4958_s6 + $0x60] sm:$0xff]  }
  0xde   : > { %1127 = vst.msk [vmem:[#allocation2 + $0x8] sm:$0xff] %vm1125_vm4, %v1080_v40  ;;  %2893 = vrot.lane.b32.xlu0 %v2852_v1, %s4774_s30  ;;  %v1634_v12 = vshll.u32 %v4457_v62, 16 }
  0xdf   : > { %v1694_v4 = vpop.permute.xlu1 %1693  ;;  %1308 = vst.msk [vmem:[#allocation2 + $0x8] sm:$0xff] %vm1306_vm5, %v5171_v7  ;;  %v689_v7 = vrot.slane %v687_v11, 1  ;;  %v685_v18 = vor.u32 %v684_v14, %v680_v6  ;;  %v1625_v5 = vor.u32 %v1624_v59, %v1620_v56  ;;  %v1629_v6 = vrot.slane %v1627_v60, 1  ;;  %v4476_v60 = vld [vmem:[%s4958_s6 + $0x60] sm:$0xff]  }
  0xe0   : > { %1741 = vst.msk [vmem:[#allocation2 + $0x8] sm:$0xff] %vm1739_vm6, %v1694_v4  ;;  %v1692_v13 = vpop.permute.xlu0 %1691  ;;  %v4459_v4 = vld [vmem:[%s4958_s6 + $0x60] sm:$0xff]   ;;  %v1632_v11 = vshrl.u32 %v4457_v62, 16  ;;  %v1581_v14 = vrot.slane %v1579_v8, 1  ;;  %v1954_v59 = vrot.slane %v4468_v51, 1 }
  0xe1   : > { %1740 = vst.msk [vmem:[#allocation2] sm:$0xff] %vm1739_vm6, %v1692_v13  ;;  %809 = vrot.lane.b32.xlu1 %v738_v16, %s4770_s12  ;;  %v690_v23 = vsel %vm594_vm1, %v685_v18, %v689_v7  ;;  %v1630_v13 = vsel %vm594_vm1, %v1625_v5, %v1629_v6  ;;  %v1584_v15 = vshrl.u32 %v4459_v4, 16  ;;  %v1577_v16 = vor.u32 %v1576_v9, %v1572_v2  ;;  %v4475_v2 = vld [vmem:[%s4958_s6 + $0x98] ss:$0 sps:$4 sm:$0x11]   ;;  %v4472_v6 = vld [vmem:[%s4958_s6 + $0x6c] sm:$0xff]  }
  0xe2   : > { %2030 = vst.msk [vmem:[#allocation2 + $0x8] sm:$0xff] %vm2028_vm7, %v1983_v54  ;;  %2029 = vst.msk [vmem:[#allocation2] sm:$0xff] %vm2028_vm7, %v5186_v24  ;;  %801 = vrot.lane.b32.xlu0 %v690_v23, %s4770_s12  ;;  %v4441_v24 = vld [vmem:[%s4958_s6 + $0x8c] ss:$0 sps:$4 sm:$0x11]   ;;  %v3035_v54 = vsel %vm3033_vm11, %v4452_v50, 0 }
  0xe3   : > { %v2164_v19 = vpop.permute.xlu1 %2163  ;;  %v1063_v35 = vrot.slane %v4441_v24, 1  ;;  %4176 = vmatpush3.bf16.msra.mxu0 %v3035_v54  ;;  %4214 = vmatpush3.bf16.msra.mxu1 %v3035_v54  ;;  %v1586_v21 = vshll.u32 %v4459_v4, 16  ;;  %v1582_v23 = vsel %vm594_vm1, %v1577_v16, %v1581_v14  ;;  %v4462_v24 = vld [vmem:[%s4958_s6 + $0x8c] ss:$0 sps:$4 sm:$0x11]   ;;  %v2525_v4 = vshll.u32 %v4474_v58, 16 }
  0xe4   : > { %2211 = vst.msk [vmem:[#allocation2 + $0x8] sm:$0xff] %vm2209_vm8, %v2164_v19  ;;  %v2162_v25 = vpop.permute.xlu0 %2161  ;;  %v1636_v19 = vrot.slane %v1634_v12, 1  ;;  %v1963_v36 = vrot.slane %v4462_v24, 1  ;;  %v4467_v50 = vld [vmem:[%s4958_s6 + $0x60] sm:$0xfe]   ;;  %v2475_v5 = vshrl.u32 %v4476_v60, 16 }
  0xe5   : > { %2210 = vst.msk [vmem:[#allocation2] sm:$0xff] %vm2209_vm8, %v2162_v25  ;;  %1097 = vrot.lane.b32.xlu1 %v1061_v26, %s4769_s25  ;;  %v1064_v40 = vsel %vm1028_vm0, %v1062_v33, %v1063_v35  ;;  %v1641_v26 = vrot.slane %v1639_v20, 1  ;;  %v1588_v27 = vrot.slane %v1586_v21, 1  ;;  %v1962_v35 = vrot.slane %v4461_v29, 1  ;;  %v4478_v16 = vld [vmem:[%s4958_s6 + $0x60] sm:$0xff]  }
  0xe6   : > { %1089 = vrot.lane.b32.xlu0 %v1049_v31, %s4769_s25  ;;  %v1637_v25 = vor.u32 %v1636_v19, %v1632_v11  ;;  %v1953_v55 = vrot.slane %v4467_v50, 1  ;;  %v2530_v8 = vshll.u32 %v4475_v2, 16  ;;  %v4477_v9 = vld [vmem:[%s4958_s6 + $0x68] ss:$0 sps:$4 sm:$0x11]   ;;  %v2527_v10 = vrot.slane %v2525_v4, 1 }
  0xe7   : > { %v2597_v32 = vpop.permute.xlu1 %2596  ;;  %v1589_v31 = vor.u32 %v1588_v27, %v1584_v15  ;;  %v2477_v11 = vshll.u32 %v4476_v60, 16  ;;  %v2482_v15 = vshll.u32 %v4477_v9, 16  ;;  %v4481_v19 = vld [vmem:[%s4958_s6 + $0x6c] sm:$0xff]   ;;  %410 = vst.msk [vmem:[#allocation2 + $0x40] sm:$0xff] %vm401_vm2, %v4478_v16  ;;  %v4495_v50 = vld [vmem:[%s4958_s6 + $0x9c] sm:$0xff]  }
  0xe8   : > { %2644 = vst.msk [vmem:[#allocation2 + $0x8] sm:$0xff] %vm2642_vm9, %v2597_v32  ;;  %v2595_v37 = vpop.permute.xlu0 %2594  ;;  %v1642_v30 = vsel %vm594_vm1, %v1637_v25, %v1641_v26  ;;  %v1955_v62 = vsel %vm1028_vm0, %v1953_v55, %v1954_v59  ;;  %v2532_v14 = vrot.slane %v2530_v8, 1  ;;  %v4480_v21 = vld [vmem:[%s4958_s6 + $0xa4] ss:$0 sps:$4 sm:$0x11]   ;;  %v754_v9 = vshll.u32 %v4495_v50, 16 }
  0xe9   : > { %2643 = vst.msk [vmem:[#allocation2] sm:$0xff] %vm2642_vm9, %v2595_v37  ;;  %1099 = vrot.lane.b32.xlu1 %v1064_v40, %s4769_s25  ;;  %v4463_v37 = vld [vmem:[%s4958_s6 + $0x54] sm:$0xfe]   ;;  %v1964_v40 = vsel %vm1028_vm0, %v1962_v35, %v1963_v36  ;;  %v2484_v20 = vrot.slane %v2482_v15, 1  ;;  %v2542_v29 = vshll.u32 %v4480_v21, 16 }
  0xea   : > { %1091 = vrot.lane.b32.xlu0 %v1052_v44, %s4769_s25  ;;  %v1950_v41 = vrot.slane %v4463_v37, 1  ;;  %v4482_v24 = vld [vmem:[%s4958_s6 + $0x74] ss:$0 sps:$4 sm:$0x11]  }
  0xeb   : > { %v792_v43 = vpop.permute.xlu1 %791  ;;  %v2544_v36 = vrot.slane %v2542_v29, 1  ;;  %v2494_v37 = vshll.u32 %v4482_v24, 16  ;;  %v4494_v15 = vld [vmem:[%s4958_s6 + $0xa4] ss:$0 sps:$4 sm:$0x11]  }
  0xec   : > { %838 = vst.msk [vmem:[#allocation2 + $0x10] sm:$0xff] %vm835_vm3, %v792_v43  ;;  %v2884_v45 = vpop.permute.xlu0 %2883 }
  0xed   : > { %2932 = vst.msk [vmem:[#allocation2] sm:$0xff] %vm2931_vm10, %v2884_v45  ;;  %1278 = vrot.lane.b32.xlu1 %v4446_v39, %s4767_s22  ;;  %v1594_v39 = vsel %vm594_vm1, %v1589_v31, %v1593_v34  ;;  %v4465_v45 = vld [vmem:[%s4958_s6 + $0x90] sm:$0xfe]  }
  0xee   : > { %1270 = vrot.lane.b32.xlu0 %v4447_v47, %s4767_s22  ;;  %v1952_v47 = vsel %vm1028_vm0, %v1950_v41, %v1951_v42  ;;  %v4483_v34 = vld [vmem:[%s4958_s6 + $0x6c] sm:$0xff]   ;;  %v2496_v41 = vrot.slane %v2494_v37, 1 }
  0xef   : > { %v794_v52 = vpop.permute.xlu1 %793  ;;  %411 = vst.msk [vmem:[#allocation2 + $0x48] sm:$0xff] %vm401_vm2, %v4483_v34  ;;  %v4500_v34 = vld [vmem:[%s4958_s6 + $0xa4] ss:$0 sps:$4 sm:$0x11]  }
  0xf0   : > { %v2886_v53 = vpop.permute.xlu0 %2885  ;;  %839 = vst.msk [vmem:[#allocation2 + $0x18] sm:$0xff] %vm835_vm3, %v794_v52  ;;  %v4469_v52 = vld [vmem:[%s4958_s6 + $0x90] sm:$0xff]  }
  0xf1   : > { %2933 = vst.msk [vmem:[#allocation2 + $0x8] sm:$0xff] %vm2931_vm10, %v2886_v53  ;;  %1280 = vrot.lane.b32.xlu1 %v4450_v48, %s4767_s22  ;;  %v1965_v48 = vrot.slane %v4465_v45, 1  ;;  %v4473_v53 = vld [vmem:[%s4958_s6 + $0x30] sm:$0xff]  }
  0xf2   : > { %1272 = vrot.lane.b32.xlu0 %v4451_v49, %s4767_s22  ;;  %v1966_v49 = vrot.slane %v4466_v46, 1  ;;  %406 = vst.msk [vmem:[#allocation2 + $0x20] sm:$0xff] %vm401_vm2, %v4473_v53  ;;  %v4486_v46 = vld [vmem:[%s4958_s6 + $0x98] ss:$0 sps:$4 sm:$0x11]  }
  0xf3   : > { %v1084_v63 = vpop.permute.xlu1 %1083  ;;  %v4487_v53 = vld [vmem:[%s4958_s6 + $0x60] sm:$0xfe]  }
  0xf4   : > { %v1082_v0 = vpop.permute.xlu0 %1081  ;;  %v2948_v1 = vld [vmem:[#allocation2] sm:$0xff]  ;;  %1129 = vst.msk [vmem:[#allocation2 + $0x18] sm:$0xff] %vm1125_vm4, %v1084_v63  ;;  %v1967_v54 = vsel %vm1028_vm0, %v1965_v48, %v1966_v49  ;;  %v2853_v59 = vrot.slane %v4487_v53, 1 }
  0xf5   : > { %1128 = vst.msk [vmem:[#allocation2 + $0x10] sm:$0xff] %vm1125_vm4, %v1082_v0  ;;  %4177 = vmatprep.mubr.msk.bf16.mxu0 %vm2984_vm12, %v2948_v1  ;;  %1711 = vrot.lane.b32.xlu1 %v1630_v13, %s4771_s13  ;;  %v4471_v63 = vld [vmem:[%s4958_s6 + $0x9c] sm:$0xff]  }
  0xf6   : > { %1703 = vrot.lane.b32.xlu0 %v1582_v23, %s4771_s13 }
  0xf7   : > { %v1265_v7 = vpop.permute.xlu1 %1264 }
  0xf8   : > { %v1263_v17 = vpop.permute.xlu0 %1262  ;;  %v2949_v18 = vld [vmem:[#allocation2 + $0x8] sm:$0xff]  ;;  %1310 = vst.msk [vmem:[#allocation2 + $0x18] sm:$0xff] %vm1306_vm5, %v1265_v7  ;;  %v4479_v7 = vld [vmem:[%s4958_s6 + $0x9c] sm:$0xff]  }
  0xf9   : > { %1309 = vst.msk [vmem:[#allocation2 + $0x10] sm:$0xff] %vm1306_vm5, %v1263_v17  ;;  %4178 = vmatmul.mubr.msk.bf16.vlgmr.msra.gmra.mrb[0].mxu0 %vm2984_vm12, %v2949_v18  ;;  %1713 = vrot.lane.b32.xlu1 %v1642_v30, %s4771_s13  ;;  %v2528_v17 = vor.u32 %v2527_v10, %v2523_v3  ;;  %v2479_v18 = vrot.slane %v2477_v11, 1  ;;  %v2535_v22 = vshrl.u32 %v4479_v7, 16  ;;  %v2537_v23 = vshll.u32 %v4479_v7, 16 }
  0xfa   : > { %1705 = vrot.lane.b32.xlu0 %v1594_v39, %s4771_s13  ;;  %v2487_v30 = vshrl.u32 %v4481_v19, 16  ;;  %v4484_v39 = vld [vmem:[%s4958_s6 + $0x3c] sm:$0xff]   ;;  %v752_v3 = vshrl.u32 %v4495_v50, 16 }
  0xfb   : > { %v1698_v32 = vpop.permute.xlu1 %1697  ;;  %v2533_v25 = vsel %vm594_vm1, %v2528_v17, %v2532_v14  ;;  %v2480_v26 = vor.u32 %v2479_v18, %v2475_v5  ;;  %v2539_v28 = vrot.slane %v2537_v23, 1  ;;  %407 = vst.msk [vmem:[#allocation2 + $0x28] sm:$0xff] %vm401_vm2, %v4484_v39  ;;  %v4492_v5 = vld [vmem:[%s4958_s6 + $0x98] ss:$0 sps:$4 sm:$0x11]   ;;  %v2869_v17 = vrot.slane %v4494_v15, 1 }
  0xfc   : > { %v1696_v33 = vpop.permute.xlu0 %1695  ;;  %1743 = vst.msk [vmem:[#allocation2 + $0x18] sm:$0xff] %vm1739_vm6, %v1698_v32  ;;  %v4493_v14 = vld [vmem:[%s4958_s6 + $0x9c] sm:$0xfe]   ;;  %v4496_v18 = vld [vmem:[%s4958_s6 + $0xa4] ss:$0 sps:$4 sm:$0x11]  }
  0xfd   : > { %1742 = vst.msk [vmem:[#allocation2 + $0x10] sm:$0xff] %vm1739_vm6, %v1696_v33  ;;  %2000 = vrot.lane.b32.xlu1 %v1964_v40, %s4768_s23  ;;  %v2485_v31 = vsel %vm594_vm1, %v2480_v26, %v2484_v20  ;;  %v2489_v33 = vshll.u32 %v4481_v19, 16  ;;  %v2540_v35 = vor.u32 %v2539_v28, %v2535_v22  ;;  %v2868_v7 = vrot.slane %v4493_v14, 1  ;;  %v4503_v28 = vld [vmem:[%s4958_s6 + $0x9c] sm:$0xff]  }
  0xfe   : > { %1992 = vrot.lane.b32.xlu0 %v1952_v47, %s4768_s23  ;;  %v4491_v47 = vld [vmem:[%s4958_s6 + $0x90] sm:$0xff]   ;;  %v756_v20 = vrot.slane %v754_v9, 1  ;;  %v759_v22 = vshll.u32 %v4496_v18, 16  ;;  %v4511_v18 = vld [vmem:[%s4958_s6 + $0xa8] sm:$0xff]  }
  0xff   : > { %v1987_v43 = vpop.permute.xlu1 %1986  ;;  %v2491_v38 = vrot.slane %v2489_v33, 1  ;;  %v2545_v40 = vsel %vm594_vm1, %v2540_v35, %v2544_v36  ;;  %v2870_v29 = vsel %vm1028_vm0, %v2868_v7, %v2869_v17  ;;  %v4499_v33 = vld [vmem:[%s4958_s6 + $0x9c] sm:$0xfe]   ;;  %v4514_v7 = vld [vmem:[%s4958_s6 + $0xb0] ss:$0 sps:$4 sm:$0x11]  }
 0x100   : > { %v1985_v44 = vpop.permute.xlu0 %1984  ;;  %2032 = vst.msk [vmem:[#allocation2 + $0x18] sm:$0xff] %vm2028_vm7, %v1987_v43  ;;  %v757_v26 = vor.u32 %v756_v20, %v752_v3  ;;  %v761_v24 = vrot.slane %v759_v22, 1  ;;  %v1068_v37 = vrot.slane %v4499_v33, 1  ;;  %v4515_v17 = vld [vmem:[%s4958_s6 + $0xb4] sm:$0xff]  }
 0x101   : > { %2031 = vst.msk [vmem:[#allocation2 + $0x10] sm:$0xff] %vm2028_vm7, %v1985_v44  ;;  %2002 = vrot.lane.b32.xlu1 %v1967_v54, %s4768_s23  ;;  %v4485_v44 = vld [vmem:[%s4958_s6 + $0x90] sm:$0xfe]   ;;  %v2492_v45 = vor.u32 %v2491_v38, %v2487_v30  ;;  %v4488_v54 = vld [vmem:[%s4958_s6 + $0x68] ss:$0 sps:$4 sm:$0x11]  }
 0x102   : > { %1994 = vrot.lane.b32.xlu0 %v1955_v62, %s4768_s23  ;;  %v2865_v49 = vrot.slane %v4485_v44, 1  ;;  %v2854_v60 = vrot.slane %v4488_v54, 1  ;;  %v762_v35 = vsel %vm594_vm1, %v757_v26, %v761_v24  ;;  %v1069_v38 = vrot.slane %v4500_v34, 1  ;;  %v4501_v44 = vld [vmem:[%s4958_s6 + $0x9c] sm:$0xff]   ;;  %v4523_v34 = vld [vmem:[%s4958_s6 + $0xb4] sm:$0xff]  }
 0x103   : > { %v2168_v56 = vpop.permute.xlu1 %2167  ;;  %v2497_v51 = vsel %vm594_vm1, %v2492_v45, %v2496_v41  ;;  %v1644_v41 = vshrl.u32 %v4503_v28, 16  ;;  %v4504_v45 = vld [vmem:[%s4958_s6 + $0xa4] ss:$0 sps:$4 sm:$0x11]   ;;  %v2559_v26 = vshrl.u32 %v4515_v17, 16 }
 0x104   : > { %v2166_v57 = vpop.permute.xlu0 %2165  ;;  %2213 = vst.msk [vmem:[#allocation2 + $0x18] sm:$0xff] %vm2209_vm8, %v2168_v56  ;;  %v1651_v50 = vshll.u32 %v4504_v45, 16 }
 0x105   : > { %2212 = vst.msk [vmem:[#allocation2 + $0x10] sm:$0xff] %vm2209_vm8, %v2166_v57  ;;  %2181 = vrot.lane.b32.xlu1 %v4469_v52, %s4772_s10  ;;  %v2866_v52 = vrot.slane %v4486_v46, 1  ;;  %v740_v57 = vshrl.u32 %v4491_v47, 16  ;;  %v4505_v46 = vld [vmem:[%s4958_s6 + $0xa8] sm:$0xff]  }
 0x106   : > { %2173 = vrot.lane.b32.xlu0 %v4470_v61, %s4772_s10  ;;  %v4489_v61 = vld [vmem:[%s4958_s6 + $0x6c] sm:$0xfe]   ;;  %v1658_v53 = vshll.u32 %v4505_v46, 16 }
 0x107   : > { %v2601_v0 = vpop.permute.xlu1 %2600  ;;  %v2867_v58 = vsel %vm1028_vm0, %v2865_v49, %v2866_v52  ;;  %v2856_v2 = vrot.slane %v4489_v61, 1  ;;  %v1656_v52 = vshrl.u32 %v4505_v46, 16  ;;  %v4508_v61 = vld [vmem:[%s4958_s6 + $0xa4] ss:$0 sps:$4 sm:$0x11]  }
 0x108   : > { %v2599_v1 = vpop.permute.xlu0 %2598  ;;  %2646 = vst.msk [vmem:[#allocation2 + $0x18] sm:$0xff] %vm2642_vm9, %v2601_v0  ;;  %v742_v0 = vshll.u32 %v4491_v47, 16  ;;  %v4502_v47 = vld [vmem:[%s4958_s6 + $0xa8] sm:$0xff]   ;;  %v1969_v3 = vrot.slane %v4508_v61, 1 }
 0x109   : > { %2645 = vst.msk [vmem:[#allocation2 + $0x10] sm:$0xff] %vm2642_vm9, %v2599_v1  ;;  %2183 = vrot.lane.b32.xlu1 %v4471_v63, %s4772_s10  ;;  %v4490_v63 = vld [vmem:[%s4958_s6 + $0x74] ss:$0 sps:$4 sm:$0x11]   ;;  %v2855_v1 = vsel %vm1028_vm0, %v2853_v59, %v2854_v60  ;;  %v4507_v59 = vld [vmem:[%s4958_s6 + $0x9c] sm:$0xfe]  }
 0x10a   : > { %2175 = vrot.lane.b32.xlu0 %v4472_v6, %s4772_s10  ;;  %v2857_v4 = vrot.slane %v4490_v63, 1  ;;  %v744_v6 = vrot.slane %v742_v0, 1  ;;  %v4520_v46 = vld [vmem:[%s4958_s6 + $0xb0] ss:$0 sps:$4 sm:$0x11]  }
 0x10b   : > { %v796_v12 = vpop.permute.xlu1 %795 }
 0x10c   : > { %v2888_v13 = vpop.permute.xlu0 %2887  ;;  %840 = vst.msk [vmem:[#allocation2 + $0x20] sm:$0xff] %vm835_vm3, %v796_v12  ;;  %v2858_v10 = vsel %vm1028_vm0, %v2856_v2, %v2857_v4  ;;  %v745_v11 = vor.u32 %v744_v6, %v740_v57  ;;  %v747_v12 = vshll.u32 %v4492_v5, 16  ;;  %v1660_v57 = vrot.slane %v1658_v53, 1  ;;  %v4509_v4 = vld [vmem:[%s4958_s6 + $0xa8] sm:$0xfe]  }
 0x10d   : > { %2934 = vst.msk [vmem:[#allocation2 + $0x10] sm:$0xff] %vm2931_vm10, %v2888_v13  ;;  %2614 = vrot.lane.b32.xlu1 %v2533_v25, %s4773_s11  ;;  %v4497_v25 = vld [vmem:[%s4958_s6 + $0x90] sm:$0xfe]   ;;  %v4510_v5 = vld [vmem:[%s4958_s6 + $0xb0] ss:$0 sps:$4 sm:$0x11]  }
 0x10e   : > { %2606 = vrot.lane.b32.xlu0 %v2485_v31, %s4773_s11  ;;  %v749_v16 = vrot.slane %v747_v12, 1  ;;  %v1065_v30 = vrot.slane %v4497_v25, 1  ;;  %v1661_v63 = vor.u32 %v1660_v57, %v1656_v52  ;;  %v1971_v9 = vrot.slane %v4509_v4, 1  ;;  %v4516_v25 = vld [vmem:[%s4958_s6 + $0xbc] ss:$0 sps:$4 sm:$0x11]  }
 0x10f   : > { %v2890_v27 = vpop.permute.xlu1 %2889  ;;  %v4522_v53 = vld [vmem:[%s4958_s6 + $0xbc] ss:$0 sps:$4 sm:$0x11]  }
 0x110   : > { %2935 = vst.msk [vmem:[#allocation2 + $0x18] sm:$0xff] %vm2931_vm10, %v2890_v27  ;;  %v804_v32 = vpop.permute.xlu0 %803  ;;  %v750_v21 = vsel %vm594_vm1, %v745_v11, %v749_v16  ;;  %v4498_v27 = vld [vmem:[%s4958_s6 + $0x98] ss:$0 sps:$4 sm:$0x11]  }
 0x111   : > { %844 = vst.msk [vmem:[#allocation2 + $0x40] sm:$0xff] %vm835_vm3, %v804_v32  ;;  %2616 = vrot.lane.b32.xlu1 %v2545_v40, %s4773_s11  ;;  %v1066_v32 = vrot.slane %v4498_v27, 1  ;;  %v2561_v27 = vshll.u32 %v4515_v17, 16 }
 0x112   : > { %2608 = vrot.lane.b32.xlu0 %v2497_v51, %s4773_s11  ;;  %v4506_v51 = vld [vmem:[%s4958_s6 + $0xb0] ss:$0 sps:$4 sm:$0x11]  }
 0x113   : > { %v806_v42 = vpop.permute.xlu1 %805  ;;  %v1067_v39 = vsel %vm1028_vm0, %v1065_v30, %v1066_v32  ;;  %v2566_v32 = vshll.u32 %v4516_v25, 16  ;;  %v4532_v25 = vld [vmem:[%s4958_s6 + $0xbc] ss:$0 sps:$4 sm:$0x11]  }
 0x114   : > { %v2950_v43 = vld [vmem:[#allocation2 + $0x10] sm:$0xff]  ;;  %845 = vst.msk [vmem:[#allocation2 + $0x48] sm:$0xff] %vm835_vm3, %v806_v42  ;;  %v798_v48 = vpop.permute.xlu0 %797  ;;  %v1646_v42 = vshll.u32 %v4503_v28, 16 }
 0x115   : > { %4181 = vmatprep.mubr.msk.bf16.mxu0 %vm2984_vm12, %v2950_v43  ;;  %841 = vst.msk [vmem:[#allocation2 + $0x28] sm:$0xff] %vm835_vm3, %v798_v48  ;;  %2903 = vrot.lane.b32.xlu1 %v2867_v58, %s4774_s30  ;;  %v1070_v43 = vsel %vm1028_vm0, %v1068_v37, %v1069_v38  ;;  %v1663_v58 = vshll.u32 %v4506_v51, 16  ;;  %v771_v51 = vshll.u32 %v4520_v46, 16 }
 0x116   : > { %2895 = vrot.lane.b32.xlu0 %v2855_v1, %s4774_s30  ;;  %v1648_v49 = vrot.slane %v1646_v42, 1  ;;  %v1968_v1 = vrot.slane %v4507_v59, 1 }
 0x117   : > { %v1094_v55 = vpop.permute.xlu1 %1093  ;;  %v2951_v56 = vld [vmem:[#allocation2 + $0x18] sm:$0xff]  ;;  %v1665_v0 = vrot.slane %v1663_v58, 1  ;;  %v2875_v58 = vrot.slane %v4522_v53, 1 }
 0x118   : > { %1134 = vst.msk [vmem:[#allocation2 + $0x40] sm:$0xff] %vm1125_vm4, %v1094_v55  ;;  %4182 = vmatmul.mubr.msk.bf16.gmra.mrb[4].mxu0 %vm2984_vm12, %v2951_v56  ;;  %v1086_v62 = vpop.permute.xlu0 %1085  ;;  %v1649_v54 = vor.u32 %v1648_v49, %v1644_v41  ;;  %v1653_v56 = vrot.slane %v1651_v50, 1  ;;  %v1970_v14 = vsel %vm1028_vm0, %v1968_v1, %v1969_v3  ;;  %v776_v41 = vshrl.u32 %v4523_v34, 16  ;;  %v4521_v49 = vld [vmem:[%s4958_s6 + $0xb4] sm:$0xfe]  }
 0x119   : > { %1130 = vst.msk [vmem:[#allocation2 + $0x20] sm:$0xff] %vm1125_vm4, %v1086_v62  ;;  %2897 = vrot.lane.b32.xlu1 %v2858_v10, %s4774_s30  ;;  %v4513_v62 = vld [vmem:[%s4958_s6 + $0xa8] sm:$0xff]   ;;  %v1972_v10 = vrot.slane %v4510_v5, 1  ;;  %v2874_v57 = vrot.slane %v4521_v49, 1  ;;  %v4531_v3 = vld [vmem:[%s4958_s6 + $0xb4] sm:$0xff]  }
 0x11a   : > { %811 = vrot.lane.b32.xlu0 %v750_v21, %s4770_s12  ;;  %v1654_v2 = vsel %vm594_vm1, %v1649_v54, %v1653_v56  ;;  %v2547_v12 = vshrl.u32 %v4513_v62, 16  ;;  %v4519_v21 = vld [vmem:[%s4958_s6 + $0xa8] sm:$0xff]   ;;  %v773_v56 = vrot.slane %v771_v51, 1 }
 0x11b   : > { %v1096_v8 = vpop.permute.xlu1 %1095  ;;  %v1973_v15 = vsel %vm1028_vm0, %v1971_v9, %v1972_v10  ;;  %v764_v28 = vshrl.u32 %v4519_v21, 16  ;;  %v4525_v1 = vld [vmem:[%s4958_s6 + $0xa8] sm:$0xfe]   ;;  %v2876_v5 = vsel %vm1028_vm0, %v2874_v57, %v2875_v58  ;;  %v4527_v9 = vld [vmem:[%s4958_s6 + $0xb4] sm:$0xfe]   ;;  %v4541_v57 = vld [vmem:[%s4958_s6 + $0xc0] sm:$0xff]  }
 0x11c   : > { %1135 = vst.msk [vmem:[#allocation2 + $0x48] sm:$0xff] %vm1125_vm4, %v1096_v8  ;;  %v1088_v13 = vpop.permute.xlu0 %1087  ;;  %v1666_v8 = vsel %vm594_vm1, %v1661_v63, %v1665_v0  ;;  %v4542_v58 = vld [vmem:[%s4958_s6 + $0xcc] sm:$0xff]  }
 0x11d   : > { %1131 = vst.msk [vmem:[#allocation2 + $0x28] sm:$0xff] %vm1125_vm4, %v1088_v13  ;;  %813 = vrot.lane.b32.xlu1 %v762_v35, %s4770_s12  ;;  %v2549_v13 = vshll.u32 %v4513_v62, 16  ;;  %v4517_v35 = vld [vmem:[%s4958_s6 + $0xa8] sm:$0xfe]  }
 0x11e   : > { %2905 = vrot.lane.b32.xlu0 %v2870_v29, %s4774_s30  ;;  %v766_v29 = vshll.u32 %v4519_v21, 16  ;;  %v2871_v42 = vrot.slane %v4517_v35, 1 }
 0x11f   : > { %v1275_v19 = vpop.permute.xlu1 %1274  ;;  %v2551_v20 = vrot.slane %v2549_v13, 1  ;;  %v1074_v13 = vrot.slane %v4527_v9, 1 }
 0x120   : > { %1315 = vst.msk [vmem:[#allocation2 + $0x40] sm:$0xff] %vm1306_vm5, %v1275_v19  ;;  %v1267_v23 = vpop.permute.xlu0 %1266  ;;  %v4512_v19 = vld [vmem:[%s4958_s6 + $0xb4] sm:$0xff]   ;;  %v768_v37 = vrot.slane %v766_v29, 1 }
 0x121   : > { %1311 = vst.msk [vmem:[#allocation2 + $0x20] sm:$0xff] %vm1306_vm5, %v1267_v23  ;;  %1103 = vrot.lane.b32.xlu1 %v1070_v43, %s4769_s25  ;;  %v2554_v23 = vshll.u32 %v4514_v7, 16  ;;  %v2552_v24 = vor.u32 %v2551_v20, %v2547_v12  ;;  %v4528_v12 = vld [vmem:[%s4958_s6 + $0xbc] ss:$0 sps:$4 sm:$0x11]   ;;  %v1668_v7 = vshrl.u32 %v4531_v3, 16 }
 0x122   : > { %1101 = vrot.lane.b32.xlu0 %v1067_v39, %s4769_s25  ;;  %v2568_v39 = vrot.slane %v2566_v32, 1  ;;  %v769_v50 = vor.u32 %v768_v37, %v764_v28  ;;  %v4533_v20 = vld [vmem:[%s4958_s6 + $0xc0] sm:$0xff]  }
 0x123   : > { %v1277_v31 = vpop.permute.xlu1 %1276  ;;  %v2556_v30 = vrot.slane %v2554_v23, 1  ;;  %v4530_v23 = vld [vmem:[%s4958_s6 + $0xc0] sm:$0xff]   ;;  %v1680_v28 = vshrl.u32 %v4533_v20, 16  ;;  %v1682_v29 = vshll.u32 %v4533_v20, 16 }
 0x124   : > { %1316 = vst.msk [vmem:[#allocation2 + $0x48] sm:$0xff] %vm1306_vm5, %v1277_v31  ;;  %v1269_v36 = vpop.permute.xlu0 %1268  ;;  %v2563_v31 = vrot.slane %v2561_v27, 1  ;;  %v774_v62 = vsel %vm594_vm1, %v769_v50, %v773_v56 }
 0x125   : > { %1312 = vst.msk [vmem:[#allocation2 + $0x28] sm:$0xff] %vm1306_vm5, %v1269_v36  ;;  %1284 = vrot.lane.b32.xlu1 %v4502_v47, %s4767_s22  ;;  %v4518_v36 = vld [vmem:[%s4958_s6 + $0xb0] ss:$0 sps:$4 sm:$0x11]   ;;  %v1684_v32 = vrot.slane %v1682_v29, 1 }
 0x126   : > { %1282 = vrot.lane.b32.xlu0 %v4501_v44, %s4767_s22  ;;  %v2564_v38 = vor.u32 %v2563_v31, %v2559_v26  ;;  %v2872_v43 = vrot.slane %v4518_v36, 1  ;;  %v2557_v44 = vsel %vm594_vm1, %v2552_v24, %v2556_v30  ;;  %v4535_v26 = vld [vmem:[%s4958_s6 + $0x78] sm:$0xff]   ;;  %v1675_v24 = vshll.u32 %v4532_v25, 16  ;;  %v4534_v30 = vld [vmem:[%s4958_s6 + $0xc8] ss:$0 sps:$4 sm:$0x11]  }
 0x127   : > { %v1708_v40 = vpop.permute.xlu1 %1707  ;;  %412 = vst.msk [vmem:[#allocation2 + $0x50] sm:$0xff] %vm401_vm2, %v4535_v26  ;;  %v1687_v36 = vshll.u32 %v4534_v30, 16  ;;  %v1685_v37 = vor.u32 %v1684_v32, %v1680_v28  ;;  %v4551_v25 = vld [vmem:[%s4958_s6 + $0xcc] sm:$0xfe]  }
 0x128   : > { %1748 = vst.msk [vmem:[#allocation2 + $0x40] sm:$0xff] %vm1739_vm6, %v1708_v40  ;;  %v1700_v48 = vpop.permute.xlu0 %1699  ;;  %v2569_v45 = vsel %vm594_vm1, %v2564_v38, %v2568_v39  ;;  %v2873_v54 = vsel %vm1028_vm0, %v2871_v42, %v2872_v43  ;;  %v1677_v35 = vrot.slane %v1675_v24, 1  ;;  %v4537_v39 = vld [vmem:[%s4958_s6 + $0xb4] sm:$0xfe]   ;;  %v4555_v32 = vld [vmem:[%s4958_s6 + $0xa8] sm:$0xff]  }
 0x129   : > { %1744 = vst.msk [vmem:[#allocation2 + $0x20] sm:$0xff] %vm1739_vm6, %v1700_v48  ;;  %1717 = vrot.lane.b32.xlu1 %v1666_v8, %s4771_s13  ;;  %v778_v48 = vshll.u32 %v4523_v34, 16  ;;  %v4536_v34 = vld [vmem:[%s4958_s6 + $0x48] sm:$0xff]   ;;  %v1974_v43 = vrot.slane %v4537_v39, 1 }
 0x12a   : > { %1715 = vrot.lane.b32.xlu0 %v1654_v2, %s4771_s13  ;;  %v4526_v2 = vld [vmem:[%s4958_s6 + $0xb0] ss:$0 sps:$4 sm:$0x11]   ;;  %408 = vst.msk [vmem:[#allocation2 + $0x30] sm:$0xff] %vm401_vm2, %v4536_v34  ;;  %416 = vst.msk [vmem:[#allocation2 + $0x70] sm:$0xff] %vm401_vm2, %v4555_v32 }
 0x12b   : > { %v1710_v55 = vpop.permute.xlu1 %1709  ;;  %v780_v59 = vrot.slane %v778_v48, 1  ;;  %v1072_v8 = vrot.slane %v4526_v2, 1  ;;  %v4540_v48 = vld [vmem:[%s4958_s6 + $0xc8] ss:$0 sps:$4 sm:$0x11]  }
 0x12c   : > { %1749 = vst.msk [vmem:[#allocation2 + $0x48] sm:$0xff] %vm1739_vm6, %v1710_v55  ;;  %v1702_v60 = vpop.permute.xlu0 %1701  ;;  %v4524_v55 = vld [vmem:[%s4958_s6 + $0xbc] ss:$0 sps:$4 sm:$0x11]  }
 0x12d   : > { %1745 = vst.msk [vmem:[#allocation2 + $0x28] sm:$0xff] %vm1739_vm6, %v1702_v60  ;;  %2006 = vrot.lane.b32.xlu1 %v1973_v15, %s4768_s23  ;;  %v783_v61 = vshll.u32 %v4524_v55, 16  ;;  %v781_v63 = vor.u32 %v780_v59, %v776_v41  ;;  %v1670_v15 = vshll.u32 %v4531_v3, 16  ;;  %v4538_v41 = vld [vmem:[%s4958_s6 + $0xbc] ss:$0 sps:$4 sm:$0x11]  }
 0x12e   : > { %2004 = vrot.lane.b32.xlu0 %v1970_v14, %s4768_s23  ;;  %v1975_v46 = vrot.slane %v4538_v41, 1  ;;  %v4543_v59 = vld [vmem:[%s4958_s6 + $0x84] sm:$0xff]   ;;  %v4552_v24 = vld [vmem:[%s4958_s6 + $0xd4] ss:$0 sps:$4 sm:$0x11]  }
 0x12f   : > { %v1997_v6 = vpop.permute.xlu1 %1996  ;;  %v785_v4 = vrot.slane %v783_v61, 1  ;;  %413 = vst.msk [vmem:[#allocation2 + $0x58] sm:$0xff] %vm401_vm2, %v4543_v59  ;;  %v2881_v34 = vrot.slane %v4552_v24, 1 }
 0x130   : > { %2037 = vst.msk [vmem:[#allocation2 + $0x40] sm:$0xff] %vm2028_vm7, %v1997_v6  ;;  %v1989_v11 = vpop.permute.xlu0 %1988  ;;  %v1071_v6 = vrot.slane %v4525_v1, 1 }
 0x131   : > { %2033 = vst.msk [vmem:[#allocation2 + $0x20] sm:$0xff] %vm2028_vm7, %v1989_v11  ;;  %2187 = vrot.lane.b32.xlu1 %v4512_v19, %s4772_s10  ;;  %v786_v11 = vsel %vm594_vm1, %v781_v63, %v785_v4  ;;  %v1672_v19 = vrot.slane %v1670_v15, 1  ;;  %v4546_v63 = vld [vmem:[%s4958_s6 + $0xc8] ss:$0 sps:$4 sm:$0x11]  }
 0x132   : > { %2185 = vrot.lane.b32.xlu0 %v4511_v18, %s4772_s10  ;;  %v1073_v17 = vsel %vm1028_vm0, %v1071_v6, %v1072_v8  ;;  %v2578_v4 = vshll.u32 %v4546_v63, 16 }
 0x133   : > { %v1999_v16 = vpop.permute.xlu1 %1998  ;;  %v1673_v31 = vor.u32 %v1672_v19, %v1668_v7  ;;  %v4553_v7 = vld [vmem:[%s4958_s6 + $0x90] sm:$0xff]  }
 0x134   : > { %2038 = vst.msk [vmem:[#allocation2 + $0x48] sm:$0xff] %vm2028_vm7, %v1999_v16  ;;  %v1991_v22 = vpop.permute.xlu0 %1990  ;;  %v1075_v16 = vrot.slane %v4528_v12, 1 }
 0x135   : > { %2034 = vst.msk [vmem:[#allocation2 + $0x28] sm:$0xff] %vm2028_vm7, %v1991_v22  ;;  %2620 = vrot.lane.b32.xlu1 %v2569_v45, %s4773_s11  ;;  %v4529_v22 = vld [vmem:[%s4958_s6 + $0xb4] sm:$0xff]   ;;  %v1678_v42 = vsel %vm594_vm1, %v1673_v31, %v1677_v35  ;;  %v2880_v31 = vrot.slane %v4551_v25, 1 }
 0x136   : > { %2618 = vrot.lane.b32.xlu0 %v2557_v44, %s4773_s11  ;;  %v1076_v21 = vsel %vm1028_vm0, %v1074_v13, %v1075_v16  ;;  %v2580_v13 = vrot.slane %v2578_v4, 1  ;;  %414 = vst.msk [vmem:[#allocation2 + $0x60] sm:$0xff] %vm401_vm2, %v4553_v7  ;;  %v4556_v35 = vld [vmem:[%s4958_s6 + $0xb4] sm:$0xff]  }
 0x137   : > { %v2178_v33 = vpop.permute.xlu1 %2177  ;;  %417 = vst.msk [vmem:[#allocation2 + $0x78] sm:$0xff] %vm401_vm2, %v4556_v35 }
 0x138   : > { %2218 = vst.msk [vmem:[#allocation2 + $0x40] sm:$0xff] %vm2209_vm8, %v2178_v33  ;;  %v2170_v40 = vpop.permute.xlu0 %2169 }
 0x139   : > { %2214 = vst.msk [vmem:[#allocation2 + $0x20] sm:$0xff] %vm2209_vm8, %v2170_v40  ;;  %815 = vrot.lane.b32.xlu1 %v774_v62, %s4770_s12  ;;  %v1689_v40 = vrot.slane %v1687_v36, 1  ;;  %v4545_v62 = vld [vmem:[%s4958_s6 + $0xc0] sm:$0xff]  }
 0x13a   : > { %2907 = vrot.lane.b32.xlu0 %v2873_v54, %s4774_s30  ;;  %v1976_v54 = vsel %vm1028_vm0, %v1974_v43, %v1975_v46  ;;  %v2571_v2 = vshrl.u32 %v4545_v62, 16  ;;  %v2573_v3 = vshll.u32 %v4545_v62, 16 }
 0x13b   : > { %v2180_v47 = vpop.permute.xlu1 %2179  ;;  %v1690_v45 = vsel %vm594_vm1, %v1685_v37, %v1689_v40  ;;  %v2882_v37 = vsel %vm1028_vm0, %v2880_v31, %v2881_v34 }
 0x13c   : > { %2219 = vst.msk [vmem:[#allocation2 + $0x48] sm:$0xff] %vm2209_vm8, %v2180_v47  ;;  %v2172_v52 = vpop.permute.xlu0 %2171  ;;  %v4539_v47 = vld [vmem:[%s4958_s6 + $0xc0] sm:$0xfe]   ;;  %v2575_v9 = vrot.slane %v2573_v3, 1 }
 0x13d   : > { %2215 = vst.msk [vmem:[#allocation2 + $0x28] sm:$0xff] %vm2209_vm8, %v2172_v52  ;;  %817 = vrot.lane.b32.xlu1 %v786_v11, %s4770_s12  ;;  %v1977_v51 = vrot.slane %v4539_v47, 1  ;;  %v1978_v52 = vrot.slane %v4540_v48, 1  ;;  %s4615_s12 = scalar_lea.vmem %s5731_s27, 4096 }
 0x13e   : > { %2909 = vrot.lane.b32.xlu0 %v2876_v5, %s4774_s30  ;;  %v4548_v5 = vld [vmem:[%s4958_s6 + $0xd4] ss:$0 sps:$4 sm:$0x11]   ;;  %p4616_p6 = scmp.ne.s32.totalorder %s5731_s27, %s4615_s12 }
 0x13f   : > { %v2611_v60 = vpop.permute.xlu1 %2610  ;;  %v1979_v56 = vsel %vm1028_vm0, %v1977_v51, %v1978_v52  ;;  %v2590_v15 = vshll.u32 %v4548_v5, 16 }
 0x140   : > { %2651 = vst.msk [vmem:[#allocation2 + $0x40] sm:$0xff] %vm2642_vm9, %v2611_v60  ;;  %v2603_v0 = vpop.permute.xlu0 %2602  ;;  %v4544_v60 = vld [vmem:[%s4958_s6 + $0x54] sm:$0xff]   ;;  %p4617_p8 = pnand %p4616_p6, %p4897_p10 }
 0x141   : > { %2647 = vst.msk [vmem:[#allocation2 + $0x20] sm:$0xff] %vm2642_vm9, %v2603_v0  ;;  %1107 = vrot.lane.b32.xlu1 %v1076_v21, %s4769_s25  ;;  %v4547_v0 = vld [vmem:[%s4958_s6 + $0xcc] sm:$0xff]   ;;  %v2592_v20 = vrot.slane %v2590_v15, 1  ;;  %v4550_v21 = vld [vmem:[%s4958_s6 + $0xc8] ss:$0 sps:$4 sm:$0x11]  }
 0x142   : > { %1105 = vrot.lane.b32.xlu0 %v1073_v17, %s4769_s25  ;;  %409 = vst.msk [vmem:[#allocation2 + $0x38] sm:$0xff] %vm401_vm2, %v4544_v60  ;;  %v2583_v6 = vshrl.u32 %v4547_v0, 16  ;;  %v2585_v8 = vshll.u32 %v4547_v0, 16  ;;  %v2576_v17 = vor.u32 %v2575_v9, %v2571_v2  ;;  %v2878_v29 = vrot.slane %v4550_v21, 1  ;;  %p4618_p12 = pneg %p4617_p8 }
 0x143   : > { %v2613_v10 = vpop.permute.xlu1 %2612 }
 0x144   : > { %2652 = vst.msk [vmem:[#allocation2 + $0x48] sm:$0xff] %vm2642_vm9, %v2613_v10  ;;  %v2605_v14 = vpop.permute.xlu0 %2604 }
 0x145   : > { %2648 = vst.msk [vmem:[#allocation2 + $0x28] sm:$0xff] %vm2642_vm9, %v2605_v14  ;;  %1288 = vrot.lane.b32.xlu1 %v4530_v23, %s4767_s22  ;;  %v2587_v14 = vrot.slane %v2585_v8, 1 }
 0x146   : > { %1286 = vrot.lane.b32.xlu0 %v4529_v22, %s4767_s22  ;;  %v2581_v22 = vsel %vm594_vm1, %v2576_v17, %v2580_v13  ;;  %s5726_s22 = scalar_lea.hbm %s5870_s2, %s4151_s14 }
 0x147   : > { %v2900_v18 = vpop.permute.xlu1 %2899  ;;  %v2588_v19 = vor.u32 %v2587_v14, %v2583_v6 }
 0x148   : > { %2940 = vst.msk [vmem:[#allocation2 + $0x40] sm:$0xff] %vm2931_vm10, %v2900_v18  ;;  %v2892_v27 = vpop.permute.xlu0 %2891  ;;  %v4549_v18 = vld [vmem:[%s4958_s6 + $0xc0] sm:$0xfe]  }
 0x149   : > { %2936 = vst.msk [vmem:[#allocation2 + $0x20] sm:$0xff] %vm2931_vm10, %v2892_v27  ;;  %1721 = vrot.lane.b32.xlu1 %v1690_v45, %s4771_s13  ;;  %v2877_v23 = vrot.slane %v4549_v18, 1  ;;  %v4554_v27 = vld [vmem:[%s4958_s6 + $0x9c] sm:$0xff]   ;;  %v2593_v28 = vsel %vm594_vm1, %v2588_v19, %v2592_v20 }
 0x14a   : > { %1719 = vrot.lane.b32.xlu0 %v1678_v42, %s4771_s13  ;;  %415 = vst.msk [vmem:[#allocation2 + $0x68] sm:$0xff] %vm401_vm2, %v4554_v27  ;;  %s4775_s13 = smov [#allocation8]  }
 0x14b   : > { %v808_v33 = vpop.permute.xlu1 %807 }
 0x14c   : > { %846 = vst.msk [vmem:[#allocation2 + $0x50] sm:$0xff] %vm835_vm3, %v808_v33  ;;  %v800_v38 = vpop.permute.xlu0 %799  ;;  %v2879_v33 = vsel %vm1028_vm0, %v2877_v23, %v2878_v29 }
 0x14d   : > { %842 = vst.msk [vmem:[#allocation2 + $0x30] sm:$0xff] %vm835_vm3, %v800_v38  ;;  %2010 = vrot.lane.b32.xlu1 %v1979_v56, %s4768_s23 }
 0x14e   : > { %2008 = vrot.lane.b32.xlu0 %v1976_v54, %s4768_s23  ;;  %s3409_s23 = scalar_lea.sflag [#allocation5], %s4954_s28 }
 0x14f   : > { %v2902_v44 = vpop.permute.xlu1 %2901  ;;  %v2956_v53 = vld [vmem:[#allocation2 + $0x40] sm:$0xff] }
 0x150   : > { %2941 = vst.msk [vmem:[#allocation2 + $0x48] sm:$0xff] %vm2931_vm10, %v2902_v44  ;;  %v2894_v49 = vpop.permute.xlu0 %2893  ;;  %v2952_v50 = vld [vmem:[#allocation2 + $0x20] sm:$0xff]  ;;  %4193 = vmatprep.mubr.msk.bf16.mxu1 %vm2984_vm12, %v2956_v53 }
 0x151   : > { %2937 = vst.msk [vmem:[#allocation2 + $0x28] sm:$0xff] %vm2931_vm10, %v2894_v49  ;;  %4185 = vmatprep.mubr.msk.bf16.mxu0 %vm2984_vm12, %v2952_v50  ;;  %2191 = vrot.lane.b32.xlu1 %v4542_v58, %s4772_s10 }
 0x152   : > { %2189 = vrot.lane.b32.xlu0 %v4541_v57, %s4772_s10  ;;  %s4619_s10 = sshll.u32 %s4775_s13, 4  ;;  %s4620_s10 = int_to_ptr.vmem [resolvable:$false] %s4619_s10 }
 0x153   : > { %v810_v55 = vpop.permute.xlu1 %809  ;;  %p4622_p13 = scmp.lt.s32.totalorder %s5731_s27, %s4620_s10 }
 0x154   : > { %v802_v61 = vpop.permute.xlu0 %801  ;;  %847 = vst.msk [vmem:[#allocation2 + $0x58] sm:$0xff] %vm835_vm3, %v810_v55 }
 0x155   : > { %843 = vst.msk [vmem:[#allocation2 + $0x38] sm:$0xff] %vm835_vm3, %v802_v61  ;;  %2624 = vrot.lane.b32.xlu1 %v2593_v28, %s4773_s11 }
 0x156   : > { %2622 = vrot.lane.b32.xlu0 %v2581_v22, %s4773_s11  ;;  %s4621_s11 = scalar_lea.vmem %s4620_s10, 8192 }
 0x157   : > { %v1098_v1 = vpop.permute.xlu1 %1097  ;;  %v2957_v12 = vld [vmem:[#allocation2 + $0x48] sm:$0xff]  ;;  %p4623_p0 = scmp.lt.s32.totalorder %s4621_s11, %s4615_s12 }
 0x158   : > { %1136 = vst.msk [vmem:[#allocation2 + $0x50] sm:$0xff] %vm1125_vm4, %v1098_v1  ;;  %v1090_v10 = vpop.permute.xlu0 %1089  ;;  %v2953_v11 = vld [vmem:[#allocation2 + $0x28] sm:$0xff]  ;;  %4194 = vmatmul.mubr.msk.bf16.vlgmr.msra.gmra.mrb[0].mxu1 %vm2984_vm12, %v2957_v12 }
 0x159   : > { %1132 = vst.msk [vmem:[#allocation2 + $0x30] sm:$0xff] %vm1125_vm4, %v1090_v10  ;;  %4186 = vmatmul.mubr.msk.bf16.gmra.mrb[8].mxu0 %vm2984_vm12, %v2953_v11  ;;  %2913 = vrot.lane.b32.xlu1 %v2882_v37, %s4774_s30  ;;  %p4624_p5 = por %p4623_p0, %p4622_p13 }
 0x15a   : > { %2911 = vrot.lane.b32.xlu0 %v2879_v33, %s4774_s30 }
 0x15b   : > { %v1100_v16 = vpop.permute.xlu1 %1099  ;;  %p4625_p9 = pnand %p4624_p5, %p4618_p12 }
 0x15c   : > { %1137 = vst.msk [vmem:[#allocation2 + $0x58] sm:$0xff] %vm1125_vm4, %v1100_v16  ;;  %v1092_v26 = vpop.permute.xlu0 %1091 }
 0x15d   : > { %1133 = vst.msk [vmem:[#allocation2 + $0x38] sm:$0xff] %vm1125_vm4, %v1092_v26 }
 0x15f   : > { %v1279_v30 = vpop.permute.xlu1 %1278 }
 0x160   : > { %1317 = vst.msk [vmem:[#allocation2 + $0x50] sm:$0xff] %vm1306_vm5, %v1279_v30  ;;  %v1271_v36 = vpop.permute.xlu0 %1270 }
 0x161   : > { %1313 = vst.msk [vmem:[#allocation2 + $0x30] sm:$0xff] %vm1306_vm5, %v1271_v36 }
 0x163   : > { %v1281_v38 = vpop.permute.xlu1 %1280 }
 0x164   : > { %1318 = vst.msk [vmem:[#allocation2 + $0x58] sm:$0xff] %vm1306_vm5, %v1281_v38  ;;  %v1273_v39 = vpop.permute.xlu0 %1272 }
 0x165   : > { %1314 = vst.msk [vmem:[#allocation2 + $0x38] sm:$0xff] %vm1306_vm5, %v1273_v39 }
 0x167   : > { %v1712_v40 = vpop.permute.xlu1 %1711 }
 0x168   : > { %1750 = vst.msk [vmem:[#allocation2 + $0x50] sm:$0xff] %vm1739_vm6, %v1712_v40  ;;  %v1704_v41 = vpop.permute.xlu0 %1703 }
 0x169   : > { %1746 = vst.msk [vmem:[#allocation2 + $0x30] sm:$0xff] %vm1739_vm6, %v1704_v41 }
 0x16b   : > { %v1714_v42 = vpop.permute.xlu1 %1713 }
 0x16c   : > { %1751 = vst.msk [vmem:[#allocation2 + $0x58] sm:$0xff] %vm1739_vm6, %v1714_v42  ;;  %v1706_v43 = vpop.permute.xlu0 %1705 }
 0x16d   : > { %1747 = vst.msk [vmem:[#allocation2 + $0x38] sm:$0xff] %vm1739_vm6, %v1706_v43 }
 0x16f   : > { %v2001_v44 = vpop.permute.xlu1 %2000 }
 0x170   : > { %2039 = vst.msk [vmem:[#allocation2 + $0x50] sm:$0xff] %vm2028_vm7, %v2001_v44  ;;  %v1993_v45 = vpop.permute.xlu0 %1992 }
 0x171   : > { %2035 = vst.msk [vmem:[#allocation2 + $0x30] sm:$0xff] %vm2028_vm7, %v1993_v45 }
 0x173   : > { %v2003_v46 = vpop.permute.xlu1 %2002 }
 0x174   : > { %2040 = vst.msk [vmem:[#allocation2 + $0x58] sm:$0xff] %vm2028_vm7, %v2003_v46  ;;  %v1995_v47 = vpop.permute.xlu0 %1994 }
 0x175   : > { %2036 = vst.msk [vmem:[#allocation2 + $0x38] sm:$0xff] %vm2028_vm7, %v1995_v47 }
 0x177   : > { %v2182_v48 = vpop.permute.xlu1 %2181 }
 0x178   : > { %2220 = vst.msk [vmem:[#allocation2 + $0x50] sm:$0xff] %vm2209_vm8, %v2182_v48  ;;  %v2174_v49 = vpop.permute.xlu0 %2173 }
 0x179   : > { %2216 = vst.msk [vmem:[#allocation2 + $0x30] sm:$0xff] %vm2209_vm8, %v2174_v49 }
 0x17b   : > { %v2184_v50 = vpop.permute.xlu1 %2183 }
 0x17c   : > { %2221 = vst.msk [vmem:[#allocation2 + $0x58] sm:$0xff] %vm2209_vm8, %v2184_v50  ;;  %v2176_v51 = vpop.permute.xlu0 %2175 }
 0x17d   : > { %2217 = vst.msk [vmem:[#allocation2 + $0x38] sm:$0xff] %vm2209_vm8, %v2176_v51 }
 0x17f   : > { %v2615_v52 = vpop.permute.xlu1 %2614 }
 0x180   : > { %2653 = vst.msk [vmem:[#allocation2 + $0x50] sm:$0xff] %vm2642_vm9, %v2615_v52  ;;  %v2607_v53 = vpop.permute.xlu0 %2606 }
 0x181   : > { %2649 = vst.msk [vmem:[#allocation2 + $0x30] sm:$0xff] %vm2642_vm9, %v2607_v53 }
 0x183   : > { %v2617_v54 = vpop.permute.xlu1 %2616 }
 0x184   : > { %2654 = vst.msk [vmem:[#allocation2 + $0x58] sm:$0xff] %vm2642_vm9, %v2617_v54  ;;  %v2609_v55 = vpop.permute.xlu0 %2608 }
 0x185   : > { %2650 = vst.msk [vmem:[#allocation2 + $0x38] sm:$0xff] %vm2642_vm9, %v2609_v55 }
 0x187   : > { %v2904_v56 = vpop.permute.xlu1 %2903 }
 0x188   : > { %2942 = vst.msk [vmem:[#allocation2 + $0x50] sm:$0xff] %vm2931_vm10, %v2904_v56  ;;  %v2896_v57 = vpop.permute.xlu0 %2895 }
 0x189   : > { %2938 = vst.msk [vmem:[#allocation2 + $0x30] sm:$0xff] %vm2931_vm10, %v2896_v57 }
 0x18b   : > { %v2898_v58 = vpop.permute.xlu1 %2897 }
 0x18c   : > { %2939 = vst.msk [vmem:[#allocation2 + $0x38] sm:$0xff] %vm2931_vm10, %v2898_v58  ;;  %v812_v60 = vpop.permute.xlu0 %811 }
 0x18d   : > { %848 = vst.msk [vmem:[#allocation2 + $0x60] sm:$0xff] %vm835_vm3, %v812_v60 }
 0x18f   : > { %v2958_v59 = vld [vmem:[#allocation2 + $0x50] sm:$0xff]  ;;  %v814_v63 = vpop.permute.xlu1 %813 }
 0x190   : > { %4197 = vmatprep.mubr.msk.bf16.mxu1 %vm2984_vm12, %v2958_v59  ;;  %v2954_v61 = vld [vmem:[#allocation2 + $0x30] sm:$0xff]  ;;  %v2906_v62 = vpop.permute.xlu0 %2905  ;;  %849 = vst.msk [vmem:[#allocation2 + $0x68] sm:$0xff] %vm835_vm3, %v814_v63 }
 0x191   : > { %4189 = vmatprep.mubr.msk.bf16.mxu0 %vm2984_vm12, %v2954_v61  ;;  %2943 = vst.msk [vmem:[#allocation2 + $0x58] sm:$0xff] %vm2931_vm10, %v2906_v62 }
 0x193   : > { %v2955_v0 = vld [vmem:[#allocation2 + $0x38] sm:$0xff]  ;;  %v1104_v2 = vpop.permute.xlu1 %1103 }
 0x194   : > { %4190 = vmatmul.mubr.msk.bf16.gmra.mrb[12].mxu0 %vm2984_vm12, %v2955_v0  ;;  %v1102_v1 = vpop.permute.xlu0 %1101  ;;  %1139 = vst.msk [vmem:[#allocation2 + $0x68] sm:$0xff] %vm1125_vm4, %v1104_v2 }
 0x195   : > { %1138 = vst.msk [vmem:[#allocation2 + $0x60] sm:$0xff] %vm1125_vm4, %v1102_v1 }
 0x197   : > { %v1285_v4 = vpop.permute.xlu1 %1284 }
 0x198   : > { %v1283_v3 = vpop.permute.xlu0 %1282  ;;  %v2959_v5 = vld [vmem:[#allocation2 + $0x58] sm:$0xff]  ;;  %1320 = vst.msk [vmem:[#allocation2 + $0x68] sm:$0xff] %vm1306_vm5, %v1285_v4 }
 0x199   : > { %1319 = vst.msk [vmem:[#allocation2 + $0x60] sm:$0xff] %vm1306_vm5, %v1283_v3  ;;  %4198 = vmatmul.mubr.msk.bf16.gmra.mrb[4].mxu1 %vm2984_vm12, %v2959_v5 }
 0x19b   : > { %v1718_v8 = vpop.permute.xlu1 %1717 }
 0x19c   : > { %v1716_v6 = vpop.permute.xlu0 %1715  ;;  %1753 = vst.msk [vmem:[#allocation2 + $0x68] sm:$0xff] %vm1739_vm6, %v1718_v8 }
 0x19d   : > { %1752 = vst.msk [vmem:[#allocation2 + $0x60] sm:$0xff] %vm1739_vm6, %v1716_v6 }
 0x19f   : > { %v2007_v10 = vpop.permute.xlu1 %2006 }
 0x1a0   : > { %v2005_v9 = vpop.permute.xlu0 %2004  ;;  %2042 = vst.msk [vmem:[#allocation2 + $0x68] sm:$0xff] %vm2028_vm7, %v2007_v10 }
 0x1a1   : > { %2041 = vst.msk [vmem:[#allocation2 + $0x60] sm:$0xff] %vm2028_vm7, %v2005_v9 }
 0x1a3   : > { %v2188_v12 = vpop.permute.xlu1 %2187 }
 0x1a4   : > { %v2186_v11 = vpop.permute.xlu0 %2185  ;;  %2223 = vst.msk [vmem:[#allocation2 + $0x68] sm:$0xff] %vm2209_vm8, %v2188_v12 }
 0x1a5   : > { %2222 = vst.msk [vmem:[#allocation2 + $0x60] sm:$0xff] %vm2209_vm8, %v2186_v11 }
 0x1a7   : > { %v2621_v14 = vpop.permute.xlu1 %2620 }
 0x1a8   : > { %v2619_v13 = vpop.permute.xlu0 %2618  ;;  %2656 = vst.msk [vmem:[#allocation2 + $0x68] sm:$0xff] %vm2642_vm9, %v2621_v14 }
 0x1a9   : > { %2655 = vst.msk [vmem:[#allocation2 + $0x60] sm:$0xff] %vm2642_vm9, %v2619_v13 }
 0x1ab   : > { %v816_v16 = vpop.permute.xlu1 %815 }
 0x1ac   : > { %v2908_v15 = vpop.permute.xlu0 %2907  ;;  %850 = vst.msk [vmem:[#allocation2 + $0x70] sm:$0xff] %vm835_vm3, %v816_v16 }
 0x1ad   : > { %2944 = vst.msk [vmem:[#allocation2 + $0x60] sm:$0xff] %vm2931_vm10, %v2908_v15 }
 0x1af   : > { %v818_v17 = vpop.permute.xlu1 %817 }
 0x1b0   : > { %v2910_v7 = vpop.permute.xlu0 %2909  ;;  %851 = vst.msk [vmem:[#allocation2 + $0x78] sm:$0xff] %vm835_vm3, %v818_v17 }
 0x1b1   : > { %2945 = vst.msk [vmem:[#allocation2 + $0x68] sm:$0xff] %vm2931_vm10, %v2910_v7 }
 0x1b3   : > { %v1108_v19 = vpop.permute.xlu1 %1107 }
 0x1b4   : > { %v1106_v18 = vpop.permute.xlu0 %1105  ;;  %v2960_v20 = vld [vmem:[#allocation2 + $0x60] sm:$0xff]  ;;  %1141 = vst.msk [vmem:[#allocation2 + $0x78] sm:$0xff] %vm1125_vm4, %v1108_v19 }
 0x1b5   : > { %1140 = vst.msk [vmem:[#allocation2 + $0x70] sm:$0xff] %vm1125_vm4, %v1106_v18  ;;  %4201 = vmatprep.mubr.msk.bf16.mxu1 %vm2984_vm12, %v2960_v20 }
 0x1b7   : > { %v1289_v22 = vpop.permute.xlu1 %1288 }
 0x1b8   : > { %v1287_v21 = vpop.permute.xlu0 %1286  ;;  %v2961_v23 = vld [vmem:[#allocation2 + $0x68] sm:$0xff]  ;;  %1322 = vst.msk [vmem:[#allocation2 + $0x78] sm:$0xff] %vm1306_vm5, %v1289_v22 }
 0x1b9   : > { %1321 = vst.msk [vmem:[#allocation2 + $0x70] sm:$0xff] %vm1306_vm5, %v1287_v21  ;;  %4202 = vmatmul.mubr.msk.bf16.gmra.mrb[8].mxu1 %vm2984_vm12, %v2961_v23 }
 0x1bb   : > { %v1722_v26 = vpop.permute.xlu1 %1721 }
 0x1bc   : > { %v1720_v25 = vpop.permute.xlu0 %1719  ;;  %1755 = vst.msk [vmem:[#allocation2 + $0x78] sm:$0xff] %vm1739_vm6, %v1722_v26 }
 0x1bd   : > { %1754 = vst.msk [vmem:[#allocation2 + $0x70] sm:$0xff] %vm1739_vm6, %v1720_v25 }
 0x1bf   : > { %v2011_v28 = vpop.permute.xlu1 %2010 }
 0x1c0   : > { %v2009_v27 = vpop.permute.xlu0 %2008  ;;  %2044 = vst.msk [vmem:[#allocation2 + $0x78] sm:$0xff] %vm2028_vm7, %v2011_v28 }
 0x1c1   : > { %2043 = vst.msk [vmem:[#allocation2 + $0x70] sm:$0xff] %vm2028_vm7, %v2009_v27 }
 0x1c3   : > { %v2192_v30 = vpop.permute.xlu1 %2191 }
 0x1c4   : > { %v2190_v24 = vpop.permute.xlu0 %2189  ;;  %2225 = vst.msk [vmem:[#allocation2 + $0x78] sm:$0xff] %vm2209_vm8, %v2192_v30 }
 0x1c5   : > { %2224 = vst.msk [vmem:[#allocation2 + $0x70] sm:$0xff] %vm2209_vm8, %v2190_v24 }
 0x1c7   : > { %v2625_v49 = vpop.permute.xlu1 %2624 }
 0x1c8   : > { %v2623_v45 = vpop.permute.xlu0 %2622  ;;  %2658 = vst.msk [vmem:[#allocation2 + $0x78] sm:$0xff] %vm2642_vm9, %v2625_v49 }
 0x1c9   : > { %2657 = vst.msk [vmem:[#allocation2 + $0x70] sm:$0xff] %vm2642_vm9, %v2623_v45 }
 0x1cb   : > { %v2914_v53 = vpop.permute.xlu1 %2913 }
 0x1cc   : > { %v4179_v29 = vpop.f32.mrb[0].mxu0  ;;  %v2912_v52 = vpop.permute.xlu0 %2911  ;;  %2947 = vst.msk [vmem:[#allocation2 + $0x78] sm:$0xff] %vm2931_vm10, %v2914_v53 }
 0x1cd   : > { %3201 = vst.msk [vmem:[%s5597_s9 + $0x10] sm:$0xff] %vm3198_vm13, %v4179_v29  ;;  %v3232_v31 = vsel %vm3198_vm13, %v4179_v29, 0.0  ;;  %v3304_v32 = vmul.f32 %v4179_v29, %v4179_v29  ;;  %v3071_v33 = vpop.f32.mrb[1].mxu0 }
 0x1ce   : > { %3199 = vst.msk [vmem:[%s5597_s9] sm:$0xff] %vm3198_vm13, %v3071_v33  ;;  %v3231_v35 = vsel %vm3198_vm13, %v3071_v33, 0.0  ;;  %v3302_v36 = vmul.f32 %v3071_v33, %v3071_v33  ;;  %v4180_v37 = vpop.f32.mrb[2].mxu0 }
 0x1cf   : > { %v3335_v34 = vsel %vm3198_vm13, %v3304_v32, 0.0  ;;  %v3233_v38 = vadd.f32 %v3232_v31, %v3231_v35  ;;  %3202 = vst.msk [vmem:[%s5597_s9 + $0x18] sm:$0xff] %vm3198_vm13, %v4180_v37  ;;  %v3263_v39 = vsel %vm3198_vm13, %v4180_v37, 0.0  ;;  %v3305_v40 = vmul.f32 %v4180_v37, %v4180_v37  ;;  %v3074_v41 = vpop.f32.mrb[3].mxu0 }
 0x1d0   : > { %v3334_v42 = vsel %vm3198_vm13, %v3302_v36, 0.0  ;;  %3200 = vst.msk [vmem:[%s5597_s9 + $0x8] sm:$0xff] %vm3198_vm13, %v3074_v41  ;;  %v3262_v43 = vsel %vm3198_vm13, %v3074_v41, 0.0  ;;  %v3303_v44 = vmul.f32 %v3074_v41, %v3074_v41 }
 0x1d1   : > { %v3336_v46 = vadd.f32 %v3335_v34, %v3334_v42  ;;  %v3366_v47 = vsel %vm3198_vm13, %v3305_v40, 0.0  ;;  %v3264_v48 = vadd.f32 %v3263_v39, %v3262_v43  ;;  %2946 = vst.msk [vmem:[#allocation2 + $0x70] sm:$0xff] %vm2931_vm10, %v2912_v52 }
 0x1d2   : > { %v3365_v50 = vsel %vm3198_vm13, %v3303_v44, 0.0 }
 0x1d3   : > { %v3367_v51 = vadd.f32 %v3366_v47, %v3365_v50  ;;  %v2963_v55 = vld [vmem:[#allocation2 + $0x78] sm:$0xff] }
 0x1d8   : > { %v2962_v54 = vld [vmem:[#allocation2 + $0x70] sm:$0xff] }
 0x1d9   : > { %4205 = vmatprep.mubr.msk.bf16.mxu1 %vm2984_vm12, %v2962_v54 }
 0x1da   : > { %4206 = vmatmul.mubr.msk.bf16.gmra.mrb[12].mxu1 %vm2984_vm12, %v2963_v55 }
 0x1eb   : > { %v4183_v56 = vpop.f32.mrb[4].mxu0 }
 0x1ec   : > { %3205 = vst.msk [vmem:[%s5597_s9 + $0x30] sm:$0xff] %vm3198_vm13, %v4183_v56  ;;  %v3087_v57 = vpop.f32.mrb[5].mxu0  ;;  %v3308_v58 = vmul.f32 %v4183_v56, %v4183_v56  ;;  %v3236_v62 = vsel %vm3198_vm13, %v4183_v56, 0.0 }
 0x1ed   : > { %3203 = vst.msk [vmem:[%s5597_s9 + $0x20] sm:$0xff] %vm3198_vm13, %v3087_v57  ;;  %v3234_v59 = vsel %vm3198_vm13, %v3087_v57, 0.0  ;;  %v3306_v60 = vmul.f32 %v3087_v57, %v3087_v57  ;;  %v4184_v61 = vpop.f32.mrb[6].mxu0 }
 0x1ee   : > { %v3235_v63 = vadd.f32 %v3234_v59, %v3233_v38  ;;  %3206 = vst.msk [vmem:[%s5597_s9 + $0x38] sm:$0xff] %vm3198_vm13, %v4184_v61  ;;  %v3090_v0 = vpop.f32.mrb[7].mxu0  ;;  %v3309_v2 = vmul.f32 %v4184_v61, %v4184_v61  ;;  %v3339_v9 = vsel %vm3198_vm13, %v3308_v58, 0.0  ;;  %v3267_v10 = vsel %vm3198_vm13, %v4184_v61, 0.0 }
 0x1ef   : > { %v3337_v1 = vsel %vm3198_vm13, %v3306_v60, 0.0  ;;  %3204 = vst.msk [vmem:[%s5597_s9 + $0x28] sm:$0xff] %vm3198_vm13, %v3090_v0  ;;  %v3265_v3 = vsel %vm3198_vm13, %v3090_v0, 0.0  ;;  %v3307_v4 = vmul.f32 %v3090_v0, %v3090_v0 }
 0x1f0   : > { %v3338_v5 = vadd.f32 %v3337_v1, %v3336_v46  ;;  %v3266_v6 = vadd.f32 %v3265_v3, %v3264_v48  ;;  %v3237_v8 = vadd.f32 %v3236_v62, %v3235_v63  ;;  %v3370_v15 = vsel %vm3198_vm13, %v3309_v2, 0.0 }
 0x1f1   : > { %v3368_v11 = vsel %vm3198_vm13, %v3307_v4, 0.0 }
 0x1f2   : > { %v3369_v12 = vadd.f32 %v3368_v11, %v3367_v51  ;;  %v3340_v13 = vadd.f32 %v3339_v9, %v3338_v5  ;;  %v3268_v14 = vadd.f32 %v3267_v10, %v3266_v6 }
 0x1f4   : > { %v3371_v16 = vadd.f32 %v3370_v15, %v3369_v12 }
 0x22b   : > { %v4195_v17 = vpop.f32.mrb[0].mxu1 }
 0x22c   : > { %v4187_v7 = vpop.f32.mrb[8].mxu0  ;;  %3217 = vst.msk [vmem:[%s5597_s9 + $0x90] sm:$0xff] %vm3198_vm13, %v4195_v17  ;;  %v3135_v19 = vpop.f32.mrb[1].mxu1  ;;  %v3248_v45 = vsel %vm3198_vm13, %v4195_v17, 0.0  ;;  %v3320_v47 = vmul.f32 %v4195_v17, %v4195_v17 }
 0x22d   : > { %3209 = vst.msk [vmem:[%s5597_s9 + $0x50] sm:$0xff] %vm3198_vm13, %v4187_v7  ;;  %v3103_v18 = vpop.f32.mrb[9].mxu0  ;;  %v3312_v20 = vmul.f32 %v4187_v7, %v4187_v7  ;;  %3215 = vst.msk [vmem:[%s5597_s9 + $0x80] sm:$0xff] %vm3198_vm13, %v3135_v19  ;;  %v4196_v25 = vpop.f32.mrb[2].mxu1  ;;  %v3240_v33 = vsel %vm3198_vm13, %v4187_v7, 0.0  ;;  %v3246_v52 = vsel %vm3198_vm13, %v3135_v19, 0.0  ;;  %v3318_v53 = vmul.f32 %v3135_v19, %v3135_v19 }
 0x22e   : > { %3207 = vst.msk [vmem:[%s5597_s9 + $0x40] sm:$0xff] %vm3198_vm13, %v3103_v18  ;;  %v3238_v21 = vsel %vm3198_vm13, %v3103_v18, 0.0  ;;  %v3310_v22 = vmul.f32 %v3103_v18, %v3103_v18  ;;  %v4188_v23 = vpop.f32.mrb[10].mxu0  ;;  %3218 = vst.msk [vmem:[%s5597_s9 + $0x98] sm:$0xff] %vm3198_vm13, %v4196_v25  ;;  %v3138_v28 = vpop.f32.mrb[3].mxu1  ;;  %v3321_v61 = vmul.f32 %v4196_v25, %v4196_v25  ;;  %v3351_v10 = vsel %vm3198_vm13, %v3320_v47, 0.0 }
 0x22f   : > { %v3239_v26 = vadd.f32 %v3238_v21, %v3237_v8  ;;  %3210 = vst.msk [vmem:[%s5597_s9 + $0x58] sm:$0xff] %vm3198_vm13, %v4188_v23  ;;  %v3106_v27 = vpop.f32.mrb[11].mxu0  ;;  %3216 = vst.msk [vmem:[%s5597_s9 + $0x88] sm:$0xff] %vm3198_vm13, %v3138_v28  ;;  %v3313_v30 = vmul.f32 %v4188_v23, %v4188_v23  ;;  %v3343_v34 = vsel %vm3198_vm13, %v3312_v20, 0.0  ;;  %v3271_v36 = vsel %vm3198_vm13, %v4188_v23, 0.0 }
 0x230   : > { %v3341_v29 = vsel %vm3198_vm13, %v3310_v22, 0.0  ;;  %3208 = vst.msk [vmem:[%s5597_s9 + $0x48] sm:$0xff] %vm3198_vm13, %v3106_v27  ;;  %v3269_v31 = vsel %vm3198_vm13, %v3106_v27, 0.0  ;;  %v3311_v32 = vmul.f32 %v3106_v27, %v3106_v27  ;;  %v3319_v1 = vmul.f32 %v3138_v28, %v3138_v28 }
 0x231   : > { %v3342_v24 = vadd.f32 %v3341_v29, %v3340_v13  ;;  %v3270_v35 = vadd.f32 %v3269_v31, %v3268_v14  ;;  %v3241_v38 = vadd.f32 %v3240_v33, %v3239_v26  ;;  %v3374_v42 = vsel %vm3198_vm13, %v3313_v30, 0.0 }
 0x232   : > { %v3372_v37 = vsel %vm3198_vm13, %v3311_v32, 0.0  ;;  %v3349_v11 = vsel %vm3198_vm13, %v3318_v53, 0.0  ;;  %v3277_v12 = vsel %vm3198_vm13, %v3138_v28, 0.0  ;;  %v3279_v15 = vsel %vm3198_vm13, %v4196_v25, 0.0 }
 0x233   : > { %v3344_v39 = vadd.f32 %v3343_v34, %v3342_v24  ;;  %v3373_v40 = vadd.f32 %v3372_v37, %v3371_v16  ;;  %v3272_v41 = vadd.f32 %v3271_v36, %v3270_v35  ;;  %v3382_v16 = vsel %vm3198_vm13, %v3321_v61, 0.0 }
 0x234   : > { %v3380_v19 = vsel %vm3198_vm13, %v3319_v1, 0.0 }
 0x235   : > { %v3375_v43 = vadd.f32 %v3374_v42, %v3373_v40 }
 0x267   : > { %v4191_v44 = vpop.f32.mrb[12].mxu0 }
 0x268   : > { %3213 = vst.msk [vmem:[%s5597_s9 + $0x70] sm:$0xff] %vm3198_vm13, %v4191_v44  ;;  %v3119_v46 = vpop.f32.mrb[13].mxu0  ;;  %v3316_v48 = vmul.f32 %v4191_v44, %v4191_v44  ;;  %v3244_v54 = vsel %vm3198_vm13, %v4191_v44, 0.0 }
 0x269   : > { %3211 = vst.msk [vmem:[%s5597_s9 + $0x60] sm:$0xff] %vm3198_vm13, %v3119_v46  ;;  %v3242_v49 = vsel %vm3198_vm13, %v3119_v46, 0.0  ;;  %v3314_v50 = vmul.f32 %v3119_v46, %v3119_v46  ;;  %v4192_v51 = vpop.f32.mrb[14].mxu0 }
 0x26a   : > { %v3243_v55 = vadd.f32 %v3242_v49, %v3241_v38  ;;  %3214 = vst.msk [vmem:[%s5597_s9 + $0x78] sm:$0xff] %vm3198_vm13, %v4192_v51  ;;  %v3122_v56 = vpop.f32.mrb[15].mxu0  ;;  %v3317_v58 = vmul.f32 %v4192_v51, %v4192_v51  ;;  %v3347_v2 = vsel %vm3198_vm13, %v3316_v48, 0.0  ;;  %v3275_v3 = vsel %vm3198_vm13, %v4192_v51, 0.0 }
 0x26b   : > { %v3345_v57 = vsel %vm3198_vm13, %v3314_v50, 0.0  ;;  %3212 = vst.msk [vmem:[%s5597_s9 + $0x68] sm:$0xff] %vm3198_vm13, %v3122_v56  ;;  %v3273_v59 = vsel %vm3198_vm13, %v3122_v56, 0.0  ;;  %v3315_v60 = vmul.f32 %v3122_v56, %v3122_v56 }
 0x26c   : > { %v3245_v62 = vadd.f32 %v3244_v54, %v3243_v55  ;;  %v3346_v63 = vadd.f32 %v3345_v57, %v3344_v39  ;;  %v3274_v0 = vadd.f32 %v3273_v59, %v3272_v41  ;;  %v3378_v13 = vsel %vm3198_vm13, %v3317_v58, 0.0  ;;  %v4199_v14 = vpop.f32.mrb[4].mxu1 }
 0x26d   : > { %v3376_v4 = vsel %vm3198_vm13, %v3315_v60, 0.0  ;;  %3221 = vst.msk [vmem:[%s5597_s9 + $0xb0] sm:$0xff] %vm3198_vm13, %v4199_v14  ;;  %v3151_v18 = vpop.f32.mrb[5].mxu1  ;;  %v3252_v25 = vsel %vm3198_vm13, %v4199_v14, 0.0  ;;  %v3324_v27 = vmul.f32 %v4199_v14, %v4199_v14 }
 0x26e   : > { %v3348_v5 = vadd.f32 %v3347_v2, %v3346_v63  ;;  %v3276_v6 = vadd.f32 %v3275_v3, %v3274_v0  ;;  %v3377_v8 = vadd.f32 %v3376_v4, %v3375_v43  ;;  %v3247_v9 = vadd.f32 %v3246_v52, %v3245_v62  ;;  %3219 = vst.msk [vmem:[%s5597_s9 + $0xa0] sm:$0xff] %vm3198_vm13, %v3151_v18  ;;  %v4200_v23 = vpop.f32.mrb[6].mxu1 }
 0x26f   : > { %v3322_v21 = vmul.f32 %v3151_v18, %v3151_v18  ;;  %v3250_v28 = vsel %vm3198_vm13, %v3151_v18, 0.0  ;;  %3222 = vst.msk [vmem:[%s5597_s9 + $0xb8] sm:$0xff] %vm3198_vm13, %v4200_v23  ;;  %v3154_v29 = vpop.f32.mrb[7].mxu1  ;;  %v3325_v31 = vmul.f32 %v4200_v23, %v4200_v23  ;;  %v3355_v40 = vsel %vm3198_vm13, %v3324_v27, 0.0 }
 0x270   : > { %v3278_v7 = vadd.f32 %v3277_v12, %v3276_v6  ;;  %v3379_v17 = vadd.f32 %v3378_v13, %v3377_v8  ;;  %v3249_v20 = vadd.f32 %v3248_v45, %v3247_v9  ;;  %v3350_v22 = vadd.f32 %v3349_v11, %v3348_v5  ;;  %3220 = vst.msk [vmem:[%s5597_s9 + $0xa8] sm:$0xff] %vm3198_vm13, %v3154_v29 }
 0x271   : > { %v3353_v33 = vsel %vm3198_vm13, %v3322_v21, 0.0  ;;  %v3281_v34 = vsel %vm3198_vm13, %v3154_v29, 0.0  ;;  %v3323_v35 = vmul.f32 %v3154_v29, %v3154_v29  ;;  %v3283_v41 = vsel %vm3198_vm13, %v4200_v23, 0.0 }
 0x272   : > { %v3381_v26 = vadd.f32 %v3380_v19, %v3379_v17  ;;  %v3251_v24 = vadd.f32 %v3250_v28, %v3249_v20  ;;  %v3352_v30 = vadd.f32 %v3351_v10, %v3350_v22  ;;  %v3280_v32 = vadd.f32 %v3279_v15, %v3278_v7 }
 0x273   : > { %v3384_v42 = vsel %vm3198_vm13, %v3323_v35, 0.0  ;;  %v3386_v46 = vsel %vm3198_vm13, %v3325_v31, 0.0 }
 0x274   : > { %v3383_v36 = vadd.f32 %v3382_v16, %v3381_v26  ;;  %v3354_v37 = vadd.f32 %v3353_v33, %v3352_v30  ;;  %v3282_v38 = vadd.f32 %v3281_v34, %v3280_v32  ;;  %v3253_v39 = vadd.f32 %v3252_v25, %v3251_v24 }
 0x276   : > { %v3385_v43 = vadd.f32 %v3384_v42, %v3383_v36  ;;  %v3356_v44 = vadd.f32 %v3355_v40, %v3354_v37  ;;  %v3284_v45 = vadd.f32 %v3283_v41, %v3282_v38 }
 0x278   : > { %v3387_v47 = vadd.f32 %v3386_v46, %v3385_v43 }
 0x28c   : > { %v4203_v48 = vpop.f32.mrb[8].mxu1 }
 0x28d   : > { %3225 = vst.msk [vmem:[%s5597_s9 + $0xd0] sm:$0xff] %vm3198_vm13, %v4203_v48  ;;  %v3167_v49 = vpop.f32.mrb[9].mxu1  ;;  %v3328_v50 = vmul.f32 %v4203_v48, %v4203_v48  ;;  %v3256_v54 = vsel %vm3198_vm13, %v4203_v48, 0.0 }
 0x28e   : > { %3223 = vst.msk [vmem:[%s5597_s9 + $0xc0] sm:$0xff] %vm3198_vm13, %v3167_v49  ;;  %v3254_v51 = vsel %vm3198_vm13, %v3167_v49, 0.0  ;;  %v3326_v52 = vmul.f32 %v3167_v49, %v3167_v49  ;;  %v4204_v53 = vpop.f32.mrb[10].mxu1 }
 0x28f   : > { %v3255_v55 = vadd.f32 %v3254_v51, %v3253_v39  ;;  %3226 = vst.msk [vmem:[%s5597_s9 + $0xd8] sm:$0xff] %vm3198_vm13, %v4204_v53  ;;  %v3170_v56 = vpop.f32.mrb[11].mxu1  ;;  %v3329_v58 = vmul.f32 %v4204_v53, %v4204_v53  ;;  %v3359_v0 = vsel %vm3198_vm13, %v3328_v50, 0.0  ;;  %v3287_v1 = vsel %vm3198_vm13, %v4204_v53, 0.0 }
 0x290   : > { %v3357_v57 = vsel %vm3198_vm13, %v3326_v52, 0.0  ;;  %3224 = vst.msk [vmem:[%s5597_s9 + $0xc8] sm:$0xff] %vm3198_vm13, %v3170_v56  ;;  %v3285_v59 = vsel %vm3198_vm13, %v3170_v56, 0.0  ;;  %v3327_v60 = vmul.f32 %v3170_v56, %v3170_v56 }
 0x291   : > { %v3358_v61 = vadd.f32 %v3357_v57, %v3356_v44  ;;  %v3286_v62 = vadd.f32 %v3285_v59, %v3284_v45  ;;  %v3257_v63 = vadd.f32 %v3256_v54, %v3255_v55  ;;  %v3390_v6 = vsel %vm3198_vm13, %v3329_v58, 0.0 }
 0x292   : > { %v3388_v2 = vsel %vm3198_vm13, %v3327_v60, 0.0 }
 0x293   : > { %v3389_v3 = vadd.f32 %v3388_v2, %v3387_v47  ;;  %v3360_v4 = vadd.f32 %v3359_v0, %v3358_v61  ;;  %v3288_v5 = vadd.f32 %v3287_v1, %v3286_v62 }
 0x295   : > { %v3391_v8 = vadd.f32 %v3390_v6, %v3389_v3 }
 0x2ad   : > { %v4207_v9 = vpop.f32.mrb[12].mxu1 }
 0x2ae   : > { %3229 = vst.msk [vmem:[%s5597_s9 + $0xf0] sm:$0xff] %vm3198_vm13, %v4207_v9  ;;  %v3183_v10 = vpop.f32.mrb[13].mxu1  ;;  %v3332_v11 = vmul.f32 %v4207_v9, %v4207_v9  ;;  %v3260_v15 = vsel %vm3198_vm13, %v4207_v9, 0.0 }
 0x2af   : > { %3227 = vst.msk [vmem:[%s5597_s9 + $0xe0] sm:$0xff] %vm3198_vm13, %v3183_v10  ;;  %v3258_v12 = vsel %vm3198_vm13, %v3183_v10, 0.0  ;;  %v3330_v13 = vmul.f32 %v3183_v10, %v3183_v10  ;;  %v4208_v14 = vpop.f32.mrb[14].mxu1 }
 0x2b0   : > { %v3259_v16 = vadd.f32 %v3258_v12, %v3257_v63  ;;  %3230 = vst.msk [vmem:[%s5597_s9 + $0xf8] sm:$0xff] %vm3198_vm13, %v4208_v14  ;;  %v3186_v7 = vpop.f32.mrb[15].mxu1  ;;  %v3333_v18 = vmul.f32 %v4208_v14, %v4208_v14 }
 0x2b1   : > { %v3361_v17 = vsel %vm3198_vm13, %v3330_v13, 0.0  ;;  %3228 = vst.msk [vmem:[%s5597_s9 + $0xe8] sm:$0xff] %vm3198_vm13, %v3186_v7  ;;  %v3289_v19 = vsel %vm3198_vm13, %v3186_v7, 0.0  ;;  %v3331_v20 = vmul.f32 %v3186_v7, %v3186_v7 }
 0x2b2   : > { %v3261_v21 = vadd.f32 %v3260_v15, %v3259_v16  ;;  %v3362_v22 = vadd.f32 %v3361_v17, %v3360_v4  ;;  %v3290_v23 = vadd.f32 %v3289_v19, %v3288_v5 }
 0x2b3   : > { %4628 = shalt.err (!%p4625_p9)
}
 0x2b4   : > { %s4629_s30 = scalar_lea.hbm %s5726_s22, 4096  ;;  %s4633_s14 = scalar_lea.hbm %s5870_s2, 8192 }
 0x2b5   : > { %p4630_p1 = scmp.ne.s32.totalorder %s5726_s22, %s4629_s30  ;;  %p4634_p7 = scmp.lt.u32.totalorder %s5726_s22, %s5870_s2 }
 0x2b6   : > { %p4635_p11 = scmp.lt.u32.totalorder %s4633_s14, %s4629_s30  ;;  %p4637_p6 = scmp.lt.u32.totalorder %s4629_s30, %s5726_s22 }
 0x2b7   : > { %p4631_p2 = pnand %p4630_p1, %p4897_p10 }
 0x2b8   : > { %p4636_p4 = por %p4635_p11, %p4634_p7 }
 0x2b9   : > { %p4632_p3 = pneg %p4631_p2 }
 0x2ba   : > { %p4638_p8 = por %p4637_p6, %p4636_p4 }
 0x2bc   : > { %p4639_p12 = pnand %p4638_p8, %p4632_p3 }
 0x2be   : > { %4642 = shalt.err (!%p4639_p12)
}
 0x2bf   : > { %s4776_s12 = smov 128   ;;  %v3363_v26 = vsel %vm3198_vm13, %v3332_v11, 0.0  ;;  %v3291_v25 = vsel %vm3198_vm13, %v4208_v14, 0.0  ;;  %v3392_v27 = vsel %vm3198_vm13, %v3331_v20, 0.0  ;;  %v3394_v30 = vsel %vm3198_vm13, %v3333_v18, 0.0  ;;  %s264_s13 = scalar_lea.vmem [#allocation11], %s4954_s28 }
 0x2c0   : > { %4226 = dma.vmem_to_hbm [thread:$0]  (%p4897_p10), %s5731_s27, 4096, %s5726_s22, %s3409_s23, %s4776_s12, %s4776_s12, %s4769_s25   ;;  %v3364_v28 = vadd.f32 %v3363_v26, %v3362_v22  ;;  %v3292_v29 = vadd.f32 %v3291_v25, %v3290_v23  ;;  %v3393_v24 = vadd.f32 %v3392_v27, %v3391_v8  ;;  %v3293_v31 = vsel %vm3198_vm13, %v3261_v21, 0.0 }
 0x2c1   : > { %s3413_s25 = sand.u32 1, %s4835_s21   ;;  %s4147_s27 = sshll.u32 %s4753_s18, 4  ;;  %vm3405_vm14 = vcmask 253952  }
 0x2c2   : > { %v3294_v32 = vsel %vm3198_vm13, %v3292_v29, 0.0  ;;  %v3395_v33 = vadd.f32 %v3394_v30, %v3393_v24  ;;  %v3396_v35 = vsel %vm3198_vm13, %v3364_v28, 0.0  ;;  %s258_s22 = scalar_lea.vmem [#allocation9], %s4954_s28  ;;  %s3464_s10 = sshll.u32 %s264_s13, 4  ;;  %s5792_s10 = int_to_ptr.vmem [resolvable:$true] %s3464_s10 }
 0x2c3   : > { %v3295_v34 = vadd.f32 %v3294_v32, %v3293_v31  ;;  %s3450_s23 = sshll.u32 %s258_s22, 4  ;;  %s5782_s7 = scalar_lea.hbm %s5871_s3, %s4147_s27  ;;  %s5784_s23 = int_to_ptr.vmem [resolvable:$true] %s3450_s23 }
 0x2c4   : > { %v3397_v36 = vsel %vm3198_vm13, %v3395_v33, 0.0  ;;  %s5790_s9 = scalar_lea.hbm %s5872_s4, %s4147_s27  ;;  %s5794_s14 = scalar_lea.sflag [#allocation10], %s3413_s25 }
 0x2c5   : > { %v3296_v37 = vrot.slane %v3295_v34, 4  ;;  %v3398_v38 = vadd.f32 %v3397_v36, %v3396_v35  ;;  %s4643_s26 = scalar_lea.vmem %s5784_s23, 16  ;;  %s4777_s6 = smov [#allocation9]  }
 0x2c6   : > { %p4644_p13 = scmp.ne.s32.totalorder %s5784_s23, %s4643_s26  ;;  %s4647_s12 = sshll.u32 %s4777_s6, 4  ;;  %s4648_s12 = int_to_ptr.vmem [resolvable:$false] %s4647_s12 }
 0x2c7   : > { %v3297_v39 = vadd.f32 %v3296_v37, %v3295_v34  ;;  %v3399_v40 = vrot.slane %v3398_v38, 4  ;;  %s4649_s11 = scalar_lea.vmem %s4648_s12, 32  ;;  %p4650_p9 = scmp.lt.s32.totalorder %s5784_s23, %s4648_s12 }
 0x2c8   : > { %p4645_p0 = pnand %p4644_p13, %p4897_p10  ;;  %p4651_p1 = scmp.lt.s32.totalorder %s4649_s11, %s4643_s26 }
 0x2c9   : > { %v3298_v41 = vrot.slane %v3297_v39, 2  ;;  %v3400_v42 = vadd.f32 %v3399_v40, %v3398_v38 }
 0x2ca   : > { %p4646_p5 = pneg %p4645_p0  ;;  %p4652_p2 = por %p4651_p1, %p4650_p9 }
 0x2cb   : > { %v3299_v43 = vadd.f32 %v3298_v41, %v3297_v39  ;;  %v3401_v44 = vrot.slane %v3400_v42, 2 }
 0x2cc   : > { %p4653_p3 = pnand %p4652_p2, %p4646_p5 }
 0x2cd   : > { %v3300_v45 = vrot.slane %v3299_v43, 1  ;;  %v3402_v46 = vadd.f32 %v3401_v44, %v3400_v42 }
 0x2cf   : > { %v3403_v47 = vrot.slane %v3402_v46, 1  ;;  %v3301_v48 = vadd.f32 %v3300_v45, %v3299_v43 }
 0x2d1   : > { %v3404_v49 = vadd.f32 %v3403_v47, %v3402_v46  ;;  %3406 = vst.msk [vmem:[%s258_s22] sm:$0x1] %vm3405_vm14, %v3301_v48 }
 0x2d2   : > { %4656 = shalt.err (!%p4653_p3)
}
 0x2d3   : > { %s4657_s25 = scalar_lea.hbm %s5782_s7, 16  ;;  %s4661_s30 = scalar_lea.hbm %s5871_s3, 32 }
 0x2d4   : > { %p4658_p7 = scmp.ne.s32.totalorder %s5782_s7, %s4657_s25  ;;  %p4662_p6 = scmp.lt.u32.totalorder %s5782_s7, %s5871_s3 }
 0x2d5   : > { %p4663_p8 = scmp.lt.u32.totalorder %s4661_s30, %s4657_s25  ;;  %p4665_p13 = scmp.lt.u32.totalorder %s4657_s25, %s5782_s7 }
 0x2d6   : > { %p4659_p11 = pnand %p4658_p7, %p4897_p10 }
 0x2d7   : > { %p4664_p12 = por %p4663_p8, %p4662_p6 }
 0x2d8   : > { %p4660_p4 = pneg %p4659_p11 }
 0x2d9   : > { %p4666_p0 = por %p4665_p13, %p4664_p12 }
 0x2db   : > { %p4667_p5 = pnand %p4666_p0, %p4660_p4 }
 0x2dd   : > { %4670 = shalt.err (!%p4667_p5)
}
 0x2de   : > { %4227 = dma.vmem_to_hbm [thread:$0]  (%p4897_p10), %s5784_s23, 16, %s5782_s7, %s5794_s14   ;;  %3407 = vst.msk [vmem:[%s264_s13] sm:$0x1] %vm3405_vm14, %v3404_v49 }
 0x2df   : > { %s4671_s26 = scalar_lea.vmem %s5792_s10, 16  ;;  %s4778_s6 = smov [#allocation11]  }
 0x2e0   : > { %p4672_p9 = scmp.ne.s32.totalorder %s5792_s10, %s4671_s26  ;;  %s4675_s12 = sshll.u32 %s4778_s6, 4  ;;  %s4676_s12 = int_to_ptr.vmem [resolvable:$false] %s4675_s12 }
 0x2e1   : > { %s4677_s11 = scalar_lea.vmem %s4676_s12, 32  ;;  %p4678_p3 = scmp.lt.s32.totalorder %s5792_s10, %s4676_s12 }
 0x2e2   : > { %p4673_p1 = pnand %p4672_p9, %p4897_p10  ;;  %p4679_p7 = scmp.lt.s32.totalorder %s4677_s11, %s4671_s26 }
 0x2e4   : > { %p4674_p2 = pneg %p4673_p1  ;;  %p4680_p11 = por %p4679_p7, %p4678_p3 }
 0x2e6   : > { %p4681_p4 = pnand %p4680_p11, %p4674_p2 }
 0x2e8   : > { %4684 = shalt.err (!%p4681_p4)
}
 0x2e9   : > { %s4685_s28 = scalar_lea.hbm %s5790_s9, 16  ;;  %s4689_s7 = scalar_lea.hbm %s5872_s4, 32 }
 0x2ea   : > { %p4686_p6 = scmp.ne.s32.totalorder %s5790_s9, %s4685_s28  ;;  %p4690_p13 = scmp.lt.u32.totalorder %s5790_s9, %s5872_s4 }
 0x2eb   : > { %p4691_p0 = scmp.lt.u32.totalorder %s4689_s7, %s4685_s28  ;;  %p4693_p9 = scmp.lt.u32.totalorder %s4685_s28, %s5790_s9 }
 0x2ec   : > { %p4687_p8 = pnand %p4686_p6, %p4897_p10 }
 0x2ed   : > { %p4692_p5 = por %p4691_p0, %p4690_p13 }
 0x2ee   : > { %p4688_p12 = pneg %p4687_p8 }
 0x2ef   : > { %p4694_p1 = por %p4693_p9, %p4692_p5 }
 0x2f1   : > { %p4695_p2 = pnand %p4694_p1, %p4688_p12 }
 0x2f3   : > { %4698 = shalt.err (!%p4695_p2)
}
 0x2f4   : > { %4228 = dma.vmem_to_hbm [thread:$0]  (%p4897_p10), %s5792_s10, 16, %s5790_s9, %s5794_s14  }
 0x2f5 PF: > { %s3476_s22 = sand.u32 1, %s4741_s15   ;;  %p5888_p3 = scmp.ne.s32.totalorder %s5878_s24, 0 }
 0x2f6   : > { %p5889_p7 = scmp.ge.s32.totalorder %s4761_s20, 2  ;;  %s3477_s30 = scalar_lea.sflag [#allocation5], %s3476_s22 }
 0x2f8   : > { %p4241_p11 = pnand %p5889_p7, %p5888_p3 }
 0x2fa   : > { %4732 = dma.done.wait (!%p4241_p11), %s3477_s30, 4096  }
 0x2fb   : > { %4734 = vsyncadd (!%p4241_p11), %s3477_s30, 4294963200  ;;  %s5890_s18 = sadd.s32 4294967294, %s4761_s20  }
 0x2fc   : > { %s3485_s21 = sand.u32 1, %s5890_s18  }
 0x2fd   : > { %s3486_s26 = scalar_lea.sflag [#allocation10], %s3485_s21 }
 0x2fe   : > { %4736 = dma.done.wait (!%p4241_p11), %s3486_s26, 32  }
 0x2ff   : > { %4738 = vsyncadd (!%p4241_p11), %s3486_s26, 4294967264  ;;  %s25_s20 = sadd.s32 1, %s4761_s20   ;;  %s5891_s15 = smov %s4745_s16 }
 0x300   : > { %p22_p10 = scmp.ge.s32.totalorder %s25_s20, 4   ;;  %s5892_s16 = smov %s4749_s17 }
 0x301   : > { %s5893_s17 = smov %s4906_s8  ;;  %s5894_s18 = smov %s4757_s19 }
 0x302   : > { %s5895_s19 = smov %s5897_s29  ;;  %24 = sbr.rel (!%p22_p10) target bundleno = 9 (0x9), region = 112 }
 0x309   :  { %3498 = vsyncpa [#allocation4], 1 }
 0x30a   :  { %3500 = vsyncpa [#allocation4 + $0x1], 1 }
 0x30b   :  { %3501 = vsyncpa [#allocation7], 1 }
 0x30c   :  { %3502 = vsyncpa [#allocation5], 1 }
 0x30d   :  { %3504 = vsyncpa [#allocation5 + $0x1], 1 }
 0x30e   :  { %3505 = vsyncpa [#allocation10], 1 }
 0x30f   :  { %3507 = vsyncpa [#allocation10 + $0x1], 1 }

</bundles_post_ra>
